<compile_context>
chip_gen: v5e
topology: v5e:2x2
jax: 0.10.0
libtpu: 0.0.40
codegen_flags: <defaults>
</compile_context>

<pallas_src>
import jax
import jax.numpy as jnp
import numpy as np
from jax.experimental import pallas as pl
from jax.experimental.pallas import tpu as pltpu


# ----------------------------- Pallas kernel --------------------------------
def make_encoder_kernel(offs, n_w1, n_w3, n_w4, n_w2, G, V, S, H, O_PAD):
    """Build kernel; all shape/offset constants closed over statically."""
    o_w1, o_b1, o_w3, o_b3, o_w4, o_b4, o_w2, o_b2 = offs
    f32, bf16 = jnp.float32, jnp.bfloat16

    def wmm(x, w):
        # Weight matmul: bf16 operands on the MXU, f32 accumulation.
        return jnp.dot(x.astype(bf16), w, preferred_element_type=f32)

    def prop(a, x):
        # Graph propagation kept in f32 (accuracy; these matmuls are tiny).
        return jnp.einsum("gij,gjf->gif", a, x, preferred_element_type=f32)

    def kernel(game_x_ref, state_x_ref, a_vv_ref, b_sv_ref, a_ss_ref,
               w_ref, wlin_ref, out_ref):
        # ---- conv1: TAGConv(F, H, K=2) + ReLU, G graphs fused ----------------
        gx = game_x_ref[...]                                   # (G, V, 8) f32
        a_vv = a_vv_ref[...]                                   # (G, V, V) f32
        x1 = prop(a_vv, gx)                                    # (D^-1/2 A D^-1/2)   x
        x2 = prop(a_vv, x1)                                    # (D^-1/2 A D^-1/2)^2 x
        xcat = jnp.concatenate([gx, x1, x2], axis=-1).reshape(G * V, n_w1)
        h = wmm(xcat, w_ref[o_w1:o_w1 + n_w1, :]) + w_ref[o_b1:o_b1 + 1, :].astype(f32)
        game_h = jnp.maximum(h, 0.0).reshape(G, V, H)          # (G, V, H) f32

        # ---- fused V-contraction: conv3 weighted-'add' + conv4 'mean' --------
        agg = prop(b_sv_ref[...], game_h)                      # (G, 2S, H)
        agg_hist = agg[:, :S, :]
        agg_in = agg[:, S:, :]

        # ---- conv3: GraphConv((-1,-1), H) neighbor+root fused ----------------
        sx = jnp.concatenate([agg_hist, state_x_ref[...]], axis=-1).reshape(G * S, n_w3)
        s = wmm(sx, w_ref[o_w3:o_w3 + n_w3, :]) + w_ref[o_b3:o_b3 + 1, :].astype(f32)
        state_h = jnp.maximum(s, 0.0)                          # (G*S, H)

        # ---- conv4: SAGEConv((-1,-1), H, 'mean') neighbor+root fused ---------
        sx = jnp.concatenate([agg_in.reshape(G * S, H), state_h], axis=-1)
        s = wmm(sx, w_ref[o_w4:o_w4 + n_w4, :]) + w_ref[o_b4:o_b4 + 1, :].astype(f32)
        state_h = jnp.maximum(s, 0.0)                          # (G*S, H)

        # ---- conv2: TAGConv(H, H, K=3) + ReLU --------------------------------
        sh = state_h.reshape(G, S, H)
        a_ss = a_ss_ref[...]                                   # (G, S, S) f32
        y1 = prop(a_ss, sh)
        y2 = prop(a_ss, y1)
        y3 = prop(a_ss, y2)
        ycat = jnp.concatenate([sh, y1, y2, y3], axis=-1).reshape(G * S, n_w2)
        h = wmm(ycat, w_ref[o_w2:o_w2 + n_w2, :]) + w_ref[o_b2:o_b2 + 1, :].astype(f32)
        state_h = jnp.maximum(h, 0.0)                          # (G*S, H)

        # ---- lin: Linear(H, O) with lane-dense (128-wide) output -------------
        out = wmm(state_h, wlin_ref[:H, :]) + wlin_ref[H:H + 1, :].astype(f32)
        out_ref[...] = out.reshape(G, S, O_PAD)

    return kernel


# ------------------------------- wrapper -------------------------------------
def _pack_rows(blocks, width, dtype, align=16):
    """Stack 2-D (r_i, width) blocks into one (R, width) buffer; each block
    starts on a 16-row boundary (bf16 sublane tile). Returns (buffer, offsets)."""
    offs, off = [], 0
    for b in blocks:
        offs.append(off)
        off = -(-(off + b.shape[0]) // align) * align
    buf = jnp.zeros((off, width), dtype)
    for o, b in zip(offs, blocks):
        buf = buf.at[o:o + b.shape[0], :].set(b.astype(dtype))
    return buf, tuple(offs)


def state_model_encoder(game_x, state_x, a_vv, b_hist, m_in, a_ss, params,
                        *, graphs_per_block=16, wdtype=jnp.bfloat16):
    """Batched encoder: leading dim of every graph tensor is the batch of graphs."""
    B, V, F_GAME = game_x.shape
    _, S, F_STATE = state_x.shape
    H = params["w1"].shape[-1]
    O = params["wlin"].shape[-1]

    # Lane-friendly padding: game features 5 -> 8 (hop-concat offsets 8/16) and
    # the final Linear / output to a 128-lane slab (unmasked stores).
    F_PAD = 8
    O_PAD = 128
    gx = jnp.pad(game_x, ((0, 0), (0, 0), (0, F_PAD - F_GAME))).astype(jnp.float32)
    w1p = jnp.pad(params["w1"], ((0, 0), (0, F_PAD - F_GAME), (0, 0))).reshape(3 * F_PAD, H)

    # One packed bf16 buffer for every H-wide weight & bias (single resident
    # DMA): w1 (3,8,H)->(24,H), [wrel;wroot], [wl;wr], w2 (4,H,H)->(4H,H).
    w3 = jnp.concatenate([params["wrel"], params["wroot"]], axis=0)       # (H+Fs, H)
    w4 = jnp.concatenate([params["wl"], params["wr"]], axis=0)            # (2H, H)
    w2f = params["w2"].reshape(4 * H, H)
    w_buf, offs = _pack_rows(
        [w1p, params["b1"], w3, params["brel"], w4, params["bl"], w2f, params["b2"]],
        H, wdtype)

    # Final Linear packed separately, padded to 128 lanes: rows 0:H = W, row H = bias.
    wlin_buf = jnp.concatenate(
        [jnp.pad(params["wlin"], ((0, 0), (0, O_PAD - O))),
         jnp.pad(params["blin"], ((0, 0), (0, O_PAD - O)))], axis=0).astype(wdtype)

    # Fuse the two V-contraction operators into one (2S, V) operator per graph.
    b_sv = jnp.concatenate([b_hist, m_in], axis=1).astype(jnp.float32)

    # Pad batch up to a multiple of graphs_per_block (padded graphs sliced off).
    G = graphs_per_block
    B_pad = -(-B // G) * G

    def padb(x):
        return jnp.pad(x, ((0, B_pad - B),) + ((0, 0),) * (x.ndim - 1))

    gx = padb(gx)
    sxf = padb(state_x.astype(jnp.float32))
    a_vvf = padb(a_vv.astype(jnp.float32))
    b_svf = padb(b_sv)
    a_ssf = padb(a_ss.astype(jnp.float32))

    kernel = make_encoder_kernel(
        offs, n_w1=3 * F_PAD, n_w3=H + F_STATE, n_w4=2 * H, n_w2=4 * H,
        G=G, V=V, S=S, H=H, O_PAD=O_PAD)

    # TODO(synk): for large graphs, tile the O(V^2) A@x propagation over extra
    # grid axes; size A-tiles for v7x's 64 MiB VMEM (double-buffered, set
    # pltpu.CompilerParams(vmem_limit_bytes=...)) rather than v5e/v6e's 128 MiB.
    out = pl.pallas_call(
        kernel,
        grid=(B_pad // G,),
        out_shape=jax.ShapeDtypeStruct((B_pad, S, O_PAD), jnp.float32),
        in_specs=[
            pl.BlockSpec((G, V, F_PAD), lambda b: (b, 0, 0)),
            pl.BlockSpec((G, S, F_STATE), lambda b: (b, 0, 0)),
            pl.BlockSpec((G, V, V), lambda b: (b, 0, 0)),
            pl.BlockSpec((G, 2 * S, V), lambda b: (b, 0, 0)),
            pl.BlockSpec((G, S, S), lambda b: (b, 0, 0)),
            # Weights: constant block index -> fetched once, resident in VMEM.
            pl.BlockSpec(w_buf.shape, lambda b: (0, 0)),
            pl.BlockSpec(wlin_buf.shape, lambda b: (0, 0)),
        ],
        out_specs=pl.BlockSpec((G, S, O_PAD), lambda b: (b, 0, 0)),
        compiler_params=pltpu.CompilerParams(dimension_semantics=("parallel",)),
    )(gx, sxf, a_vvf, b_svf, a_ssf, w_buf, wlin_buf)

    return out[:B, :, :O]


# --------------------- graph -> dense operator glue (plain JAX) --------------
def dense_adj(edge_index, n_dst, n_src, w=None):
    src, dst = edge_index[0], edge_index[1]
    if w is None:
        w = jnp.ones(src.shape, jnp.float32)
    return jnp.zeros((n_dst, n_src), jnp.float32).at[dst, src].add(w)


def gcn_norm_adj(edge_index, n):
    # PyG gcn_norm with add_self_loops=False, edge_weight=1, flow source->target.
    C = dense_adj(edge_index, n, n)
    deg = C.sum(axis=1)
    dis = jnp.where(deg > 0, jax.lax.rsqrt(deg), 0.0)
    return dis[:, None] * C * dis[None, :]


def mean_adj(edge_index, n_dst, n_src):
    C = dense_adj(edge_index, n_dst, n_src)
    deg = C.sum(axis=1)
    return C * jnp.where(deg > 0, 1.0 / deg, 0.0)[:, None]


# ------------------------------ pure-JAX reference ---------------------------
def reference_forward(game_x, state_x, a_vv, b_hist, m_in, a_ss, p):
    h = game_x @ p["w1"][0]
    xk = a_vv @ game_x
    h = h + xk @ p["w1"][1]
    xk = a_vv @ xk
    h = h + xk @ p["w1"][2]
    game_h = jax.nn.relu(h + p["b1"])

    s = (b_hist @ game_h) @ p["wrel"] + p["brel"] + state_x @ p["wroot"]
    state_h = jax.nn.relu(s)

    s = (m_in @ game_h) @ p["wl"] + p["bl"] + state_h @ p["wr"]
    state_h = jax.nn.relu(s)

    h = state_h @ p["w2"][0]
    xk = state_h
    for k in range(1, 4):
        xk = a_ss @ xk
        h = h + xk @ p["w2"][k]
    state_h = jax.nn.relu(h + p["b2"])
    return state_h @ p["wlin"] + p["blin"]


# ----------------------------------- main ------------------------------------
if __name__ == "__main__":
    B = 32                       # graphs encoded per call (batched into the grid)
    V, S = 16, 8                 # game vertices, state vertices per graph
    F_GAME, F_STATE = 5, 8       # game feat dim fixed to 5 by TAGConv(5, H, 2)
    H, O = 32, 16                # hidden_channels, out_channels
    E_VV, E_HIST, E_IN, E_SS = 40, 20, 12, 10

    root = jax.random.PRNGKey(0)
    kp, kg = jax.random.split(root)
    pkeys = jax.random.split(kp, 12)

    def winit(k, shape):
        return 0.1 * jax.random.normal(k, shape, jnp.float32)

    params = {
        "w1": winit(pkeys[0], (3, F_GAME, H)),  "b1": winit(pkeys[1], (1, H)),
        "wrel": winit(pkeys[2], (H, H)),        "brel": winit(pkeys[3], (1, H)),
        "wroot": winit(pkeys[4], (F_STATE, H)),
        "wl": winit(pkeys[5], (H, H)),          "bl": winit(pkeys[6], (1, H)),
        "wr": winit(pkeys[7], (H, H)),
        "w2": winit(pkeys[8], (4, H, H)),       "b2": winit(pkeys[9], (1, H)),
        "wlin": winit(pkeys[10], (H, O)),       "blin": winit(pkeys[11], (1, O)),
    }

    # Build B independent (game, state) graphs and their dense operators
    # (the edge-index scatter-adds are plain-JAX glue outside the kernel).
    game_xs, state_xs, a_vvs, b_hists, m_ins, a_sss = [], [], [], [], [], []
    gkeys = jax.random.split(kg, B)
    for i in range(B):
        k = jax.random.split(gkeys[i], 9)
        game_xs.append(jax.random.normal(k[0], (V, F_GAME), jnp.float32))
        state_xs.append(jax.random.normal(k[1], (S, F_STATE), jnp.float32))
        ei_vv = jax.random.randint(k[2], (2, E_VV), 0, V)
        ei_hist = jnp.stack([jax.random.randint(k[3], (E_HIST,), 0, V),
                             jax.random.randint(k[4], (E_HIST,), 0, S)])
        ea_hist = jax.random.uniform(k[5], (E_HIST,), jnp.float32)
        ei_in = jnp.stack([jax.random.randint(k[6], (E_IN,), 0, V),
                           jax.random.randint(k[7], (E_IN,), 0, S)])
        ei_ss = jax.random.randint(k[8], (2, E_SS), 0, S)
        a_vvs.append(gcn_norm_adj(ei_vv, V))                    # TAGConv1 norm adj
        b_hists.append(dense_adj(ei_hist, S, V, ea_hist))       # GraphConv weighted 'add'
        m_ins.append(mean_adj(ei_in, S, V))                     # SAGEConv 'mean'
        a_sss.append(gcn_norm_adj(ei_ss, S))                    # TAGConv2 norm adj

    game_x = jnp.stack(game_xs)
    state_x = jnp.stack(state_xs)
    a_vv = jnp.stack(a_vvs)
    b_hist = jnp.stack(b_hists)
    m_in = jnp.stack(m_ins)
    a_ss = jnp.stack(a_sss)

    out = state_model_encoder(game_x, state_x, a_vv, b_hist, m_in, a_ss, params,
                              graphs_per_block=16)
    out = jax.block_until_ready(out)

    ref = jax.vmap(lambda g, s, avv, bh, mi, ass:
                   reference_forward(g, s, avv, bh, mi, ass, params)
                   )(game_x, state_x, a_vv, b_hist, m_in, a_ss)

    # bf16 weight matmuls (f32 accumulation, f32 propagation) -> loose tolerance.
    np.testing.assert_allclose(np.asarray(out), np.asarray(ref), rtol=3e-2, atol=3e-2)

    print("KERNEL_OK")
</pallas_src>

<mosaic_0001>
module attributes {stable_mosaic.version = 11 : i64} {
  func.func @kernel(%arg0: i32, %arg1: memref<16x16x8xf32, #tpu.memory_space<vmem>>, %arg2: memref<16x8x8xf32, #tpu.memory_space<vmem>>, %arg3: memref<16x16x16xf32, #tpu.memory_space<vmem>>, %arg4: memref<16x16x16xf32, #tpu.memory_space<vmem>>, %arg5: memref<16x8x8xf32, #tpu.memory_space<vmem>>, %arg6: memref<336x32xbf16, #tpu.memory_space<vmem>>, %arg7: memref<33x128xbf16, #tpu.memory_space<vmem>>, %arg8: memref<16x8x128xf32, #tpu.memory_space<vmem>>) attributes {dimension_semantics = [#tpu.dimension_semantics<parallel>], iteration_bounds = array<i64: 2>, scalar_prefetch = 0 : i64, scratch_operands = 0 : i64, tpu.core_type = #tpu.core_type<tc>, window_params = [{transform_indices = @transform_0, window_bounds = array<i64: 16, 16, 8>}, {transform_indices = @transform_1, window_bounds = array<i64: 16, 8, 8>}, {transform_indices = @transform_2, window_bounds = array<i64: 16, 16, 16>}, {transform_indices = @transform_3, window_bounds = array<i64: 16, 16, 16>}, {transform_indices = @transform_4, window_bounds = array<i64: 16, 8, 8>}, {pipeline_mode = #tpu.pipeline_mode<synchronous>, transform_indices = @transform_5, window_bounds = array<i64: 336, 32>}, {pipeline_mode = #tpu.pipeline_mode<synchronous>, transform_indices = @transform_6, window_bounds = array<i64: 33, 128>}, {transform_indices = @transform_7, window_bounds = array<i64: 16, 8, 128>}]} {
    %c0 = arith.constant 0 : index
    %c0_0 = arith.constant 0 : index
    %c0_1 = arith.constant 0 : index
    %0 = vector.load %arg1[%c0, %c0_0, %c0_1] : memref<16x16x8xf32, #tpu.memory_space<vmem>>, vector<16x16x8xf32>
    %c0_2 = arith.constant 0 : index
    %c0_3 = arith.constant 0 : index
    %c0_4 = arith.constant 0 : index
    %1 = vector.load %arg3[%c0_2, %c0_3, %c0_4] : memref<16x16x16xf32, #tpu.memory_space<vmem>>, vector<16x16x16xf32>
    "tpu.trace_start"() <{level = 10 : i32, message = "gij,gjf->gif"}> : () -> ()
    %cst = arith.constant dense<0.000000e+00> : vector<16x16x8xf32>
    %2 = tpu.matmul %1, %0, %cst {dimension_numbers = #tpu.dot_dimension_numbers<[2], [1], [1], [2], [0, 0, 0, 1, 1, 2], [0], [0]>} : vector<16x16x16xf32>, vector<16x16x8xf32>, vector<16x16x8xf32> -> vector<16x16x8xf32>
    %cst_5 = arith.constant dense<0.000000e+00> : vector<16x16x8xf32>
    %3 = tpu.matmul %1, %2, %cst_5 {dimension_numbers = #tpu.dot_dimension_numbers<[2], [1], [1], [2], [0, 0, 0, 1, 1, 2], [0], [0]>} : vector<16x16x16xf32>, vector<16x16x8xf32>, vector<16x16x8xf32> -> vector<16x16x8xf32>
    "tpu.trace_stop"() : () -> ()
    %4 = tpu.concatenate %0, %2, %3 in 2 : vector<16x16x8xf32>, vector<16x16x8xf32>, vector<16x16x8xf32> -> vector<16x16x24xf32>
    %5 = vector.shape_cast %4 : vector<16x16x24xf32> to vector<256x24xf32>
    %c0_6 = arith.constant 0 : index
    %c0_7 = arith.constant 0 : index
    %6 = vector.load %arg6[%c0_6, %c0_7] : memref<336x32xbf16, #tpu.memory_space<vmem>>, vector<24x32xbf16>
    %7 = arith.truncf %5 : vector<256x24xf32> to vector<256x24xbf16>
    %cst_8 = arith.constant dense<0.000000e+00> : vector<256x32xf32>
    %8 = tpu.matmul %7, %6, %cst_8 {dimension_numbers = #tpu.dot_dimension_numbers<[1], [0], [0], [1], [0, 0, 1, 1], [], []>} : vector<256x24xbf16>, vector<24x32xbf16>, vector<256x32xf32> -> vector<256x32xf32>
    %c32 = arith.constant 32 : index
    %c0_9 = arith.constant 0 : index
    %9 = vector.load %arg6[%c32, %c0_9] : memref<336x32xbf16, #tpu.memory_space<vmem>>, vector<1x32xbf16>
    %10 = arith.extf %9 : vector<1x32xbf16> to vector<1x32xf32>
    %11 = vector.broadcast %10 : vector<1x32xf32> to vector<256x32xf32>
    %12 = arith.addf %8, %11 : vector<256x32xf32>
    %cst_10 = arith.constant 0.000000e+00 : f32
    %13 = vector.broadcast %cst_10 : f32 to vector<256x32xf32>
    %14 = arith.maximumf %12, %13 : vector<256x32xf32>
    %15 = vector.shape_cast %14 : vector<256x32xf32> to vector<16x16x32xf32>
    %c0_11 = arith.constant 0 : index
    %c0_12 = arith.constant 0 : index
    %c0_13 = arith.constant 0 : index
    %16 = vector.load %arg4[%c0_11, %c0_12, %c0_13] : memref<16x16x16xf32, #tpu.memory_space<vmem>>, vector<16x16x16xf32>
    "tpu.trace_start"() <{level = 10 : i32, message = "gij,gjf->gif"}> : () -> ()
    %cst_14 = arith.constant dense<0.000000e+00> : vector<16x16x32xf32>
    %17 = tpu.matmul %16, %15, %cst_14 {dimension_numbers = #tpu.dot_dimension_numbers<[2], [1], [1], [2], [0, 0, 0, 1, 1, 2], [0], [0]>} : vector<16x16x16xf32>, vector<16x16x32xf32>, vector<16x16x32xf32> -> vector<16x16x32xf32>
    "tpu.trace_stop"() : () -> ()
    %18 = vector.extract_strided_slice %17 {offsets = [0, 0, 0], sizes = [16, 8, 32], strides = [1, 1, 1]} : vector<16x16x32xf32> to vector<16x8x32xf32>
    %19 = vector.extract_strided_slice %17 {offsets = [0, 8, 0], sizes = [16, 8, 32], strides = [1, 1, 1]} : vector<16x16x32xf32> to vector<16x8x32xf32>
    %c0_15 = arith.constant 0 : index
    %c0_16 = arith.constant 0 : index
    %c0_17 = arith.constant 0 : index
    %20 = vector.load %arg2[%c0_15, %c0_16, %c0_17] : memref<16x8x8xf32, #tpu.memory_space<vmem>>, vector<16x8x8xf32>
    %21 = tpu.concatenate %18, %20 in 2 : vector<16x8x32xf32>, vector<16x8x8xf32> -> vector<16x8x40xf32>
    %22 = vector.shape_cast %21 : vector<16x8x40xf32> to vector<128x40xf32>
    %c48 = arith.constant 48 : index
    %c0_18 = arith.constant 0 : index
    %23 = vector.load %arg6[%c48, %c0_18] : memref<336x32xbf16, #tpu.memory_space<vmem>>, vector<40x32xbf16>
    %24 = arith.truncf %22 : vector<128x40xf32> to vector<128x40xbf16>
    %cst_19 = arith.constant dense<0.000000e+00> : vector<128x32xf32>
    %25 = tpu.matmul %24, %23, %cst_19 {dimension_numbers = #tpu.dot_dimension_numbers<[1], [0], [0], [1], [0, 0, 1, 1], [], []>} : vector<128x40xbf16>, vector<40x32xbf16>, vector<128x32xf32> -> vector<128x32xf32>
    %c96 = arith.constant 96 : index
    %c0_20 = arith.constant 0 : index
    %26 = vector.load %arg6[%c96, %c0_20] : memref<336x32xbf16, #tpu.memory_space<vmem>>, vector<1x32xbf16>
    %27 = arith.extf %26 : vector<1x32xbf16> to vector<1x32xf32>
    %28 = vector.broadcast %27 : vector<1x32xf32> to vector<128x32xf32>
    %29 = arith.addf %25, %28 : vector<128x32xf32>
    %cst_21 = arith.constant 0.000000e+00 : f32
    %30 = vector.broadcast %cst_21 : f32 to vector<128x32xf32>
    %31 = arith.maximumf %29, %30 : vector<128x32xf32>
    %32 = vector.shape_cast %19 : vector<16x8x32xf32> to vector<128x32xf32>
    %33 = tpu.concatenate %32, %31 in 1 : vector<128x32xf32>, vector<128x32xf32> -> vector<128x64xf32>
    %c112 = arith.constant 112 : index
    %c0_22 = arith.constant 0 : index
    %34 = vector.load %arg6[%c112, %c0_22] : memref<336x32xbf16, #tpu.memory_space<vmem>>, vector<64x32xbf16>
    %35 = arith.truncf %33 : vector<128x64xf32> to vector<128x64xbf16>
    %cst_23 = arith.constant dense<0.000000e+00> : vector<128x32xf32>
    %36 = tpu.matmul %35, %34, %cst_23 {dimension_numbers = #tpu.dot_dimension_numbers<[1], [0], [0], [1], [0, 0, 1, 1], [], []>} : vector<128x64xbf16>, vector<64x32xbf16>, vector<128x32xf32> -> vector<128x32xf32>
    %c176 = arith.constant 176 : index
    %c0_24 = arith.constant 0 : index
    %37 = vector.load %arg6[%c176, %c0_24] : memref<336x32xbf16, #tpu.memory_space<vmem>>, vector<1x32xbf16>
    %38 = arith.extf %37 : vector<1x32xbf16> to vector<1x32xf32>
    %39 = vector.broadcast %38 : vector<1x32xf32> to vector<128x32xf32>
    %40 = arith.addf %36, %39 : vector<128x32xf32>
    %cst_25 = arith.constant 0.000000e+00 : f32
    %41 = vector.broadcast %cst_25 : f32 to vector<128x32xf32>
    %42 = arith.maximumf %40, %41 : vector<128x32xf32>
    %43 = vector.shape_cast %42 : vector<128x32xf32> to vector<16x8x32xf32>
    %c0_26 = arith.constant 0 : index
    %c0_27 = arith.constant 0 : index
    %c0_28 = arith.constant 0 : index
    %44 = vector.load %arg5[%c0_26, %c0_27, %c0_28] : memref<16x8x8xf32, #tpu.memory_space<vmem>>, vector<16x8x8xf32>
    "tpu.trace_start"() <{level = 10 : i32, message = "gij,gjf->gif"}> : () -> ()
    %cst_29 = arith.constant dense<0.000000e+00> : vector<16x8x32xf32>
    %45 = tpu.matmul %44, %43, %cst_29 {dimension_numbers = #tpu.dot_dimension_numbers<[2], [1], [1], [2], [0, 0, 0, 1, 1, 2], [0], [0]>} : vector<16x8x8xf32>, vector<16x8x32xf32>, vector<16x8x32xf32> -> vector<16x8x32xf32>
    %cst_30 = arith.constant dense<0.000000e+00> : vector<16x8x32xf32>
    %46 = tpu.matmul %44, %45, %cst_30 {dimension_numbers = #tpu.dot_dimension_numbers<[2], [1], [1], [2], [0, 0, 0, 1, 1, 2], [0], [0]>} : vector<16x8x8xf32>, vector<16x8x32xf32>, vector<16x8x32xf32> -> vector<16x8x32xf32>
    %cst_31 = arith.constant dense<0.000000e+00> : vector<16x8x32xf32>
    %47 = tpu.matmul %44, %46, %cst_31 {dimension_numbers = #tpu.dot_dimension_numbers<[2], [1], [1], [2], [0, 0, 0, 1, 1, 2], [0], [0]>} : vector<16x8x8xf32>, vector<16x8x32xf32>, vector<16x8x32xf32> -> vector<16x8x32xf32>
    "tpu.trace_stop"() : () -> ()
    %48 = tpu.concatenate %43, %45, %46, %47 in 2 : vector<16x8x32xf32>, vector<16x8x32xf32>, vector<16x8x32xf32>, vector<16x8x32xf32> -> vector<16x8x128xf32>
    %49 = vector.shape_cast %48 : vector<16x8x128xf32> to vector<128x128xf32>
    %c192 = arith.constant 192 : index
    %c0_32 = arith.constant 0 : index
    %50 = vector.load %arg6[%c192, %c0_32] : memref<336x32xbf16, #tpu.memory_space<vmem>>, vector<128x32xbf16>
    %51 = arith.truncf %49 : vector<128x128xf32> to vector<128x128xbf16>
    %cst_33 = arith.constant dense<0.000000e+00> : vector<128x32xf32>
    %52 = tpu.matmul %51, %50, %cst_33 {dimension_numbers = #tpu.dot_dimension_numbers<[1], [0], [0], [1], [0, 0, 1, 1], [], []>} : vector<128x128xbf16>, vector<128x32xbf16>, vector<128x32xf32> -> vector<128x32xf32>
    %c320 = arith.constant 320 : index
    %c0_34 = arith.constant 0 : index
    %53 = vector.load %arg6[%c320, %c0_34] : memref<336x32xbf16, #tpu.memory_space<vmem>>, vector<1x32xbf16>
    %54 = arith.extf %53 : vector<1x32xbf16> to vector<1x32xf32>
    %55 = vector.broadcast %54 : vector<1x32xf32> to vector<128x32xf32>
    %56 = arith.addf %52, %55 : vector<128x32xf32>
    %cst_35 = arith.constant 0.000000e+00 : f32
    %57 = vector.broadcast %cst_35 : f32 to vector<128x32xf32>
    %58 = arith.maximumf %56, %57 : vector<128x32xf32>
    %c0_36 = arith.constant 0 : index
    %c0_37 = arith.constant 0 : index
    %59 = vector.load %arg7[%c0_36, %c0_37] : memref<33x128xbf16, #tpu.memory_space<vmem>>, vector<32x128xbf16>
    %60 = arith.truncf %58 : vector<128x32xf32> to vector<128x32xbf16>
    %cst_38 = arith.constant dense<0.000000e+00> : vector<128x128xf32>
    %61 = tpu.matmul %60, %59, %cst_38 {dimension_numbers = #tpu.dot_dimension_numbers<[1], [0], [0], [1], [0, 0, 1, 1], [], []>} : vector<128x32xbf16>, vector<32x128xbf16>, vector<128x128xf32> -> vector<128x128xf32>
    %c32_39 = arith.constant 32 : index
    %c0_40 = arith.constant 0 : index
    %62 = vector.load %arg7[%c32_39, %c0_40] : memref<33x128xbf16, #tpu.memory_space<vmem>>, vector<1x128xbf16>
    %63 = arith.extf %62 : vector<1x128xbf16> to vector<1x128xf32>
    %64 = vector.broadcast %63 : vector<1x128xf32> to vector<128x128xf32>
    %65 = arith.addf %61, %64 : vector<128x128xf32>
    %66 = vector.shape_cast %65 : vector<128x128xf32> to vector<16x8x128xf32>
    %c0_41 = arith.constant 0 : index
    %c0_42 = arith.constant 0 : index
    %c0_43 = arith.constant 0 : index
    %67 = vector.load %arg8[%c0_41, %c0_42, %c0_43] : memref<16x8x128xf32, #tpu.memory_space<vmem>>, vector<16x8x128xf32>
    tpu.vector_store %arg8[%c0_41, %c0_42, %c0_43], %66 {strides = array<i32>} : memref<16x8x128xf32, #tpu.memory_space<vmem>>, vector<16x8x128xf32>,
    return
  }
  func.func @transform_0(%arg0: i32) -> (i32, i32, i32) {
    %c0_i32 = arith.constant 0 : i32
    %c0_i32_0 = arith.constant 0 : i32
    %c0_i32_1 = arith.constant 0 : i32
    return %arg0, %c0_i32, %c0_i32_0 : i32, i32, i32
  }
  func.func @transform_1(%arg0: i32) -> (i32, i32, i32) {
    %c0_i32 = arith.constant 0 : i32
    %c0_i32_0 = arith.constant 0 : i32
    %c0_i32_1 = arith.constant 0 : i32
    return %arg0, %c0_i32, %c0_i32_0 : i32, i32, i32
  }
  func.func @transform_2(%arg0: i32) -> (i32, i32, i32) {
    %c0_i32 = arith.constant 0 : i32
    %c0_i32_0 = arith.constant 0 : i32
    %c0_i32_1 = arith.constant 0 : i32
    return %arg0, %c0_i32, %c0_i32_0 : i32, i32, i32
  }
  func.func @transform_3(%arg0: i32) -> (i32, i32, i32) {
    %c0_i32 = arith.constant 0 : i32
    %c0_i32_0 = arith.constant 0 : i32
    %c0_i32_1 = arith.constant 0 : i32
    return %arg0, %c0_i32, %c0_i32_0 : i32, i32, i32
  }
  func.func @transform_4(%arg0: i32) -> (i32, i32, i32) {
    %c0_i32 = arith.constant 0 : i32
    %c0_i32_0 = arith.constant 0 : i32
    %c0_i32_1 = arith.constant 0 : i32
    return %arg0, %c0_i32, %c0_i32_0 : i32, i32, i32
  }
  func.func @transform_5(%arg0: i32) -> (i32, i32) {
    %c0_i32 = arith.constant 0 : i32
    %c0_i32_0 = arith.constant 0 : i32
    %c0_i32_1 = arith.constant 0 : i32
    return %c0_i32, %c0_i32_0 : i32, i32
  }
  func.func @transform_6(%arg0: i32) -> (i32, i32) {
    %c0_i32 = arith.constant 0 : i32
    %c0_i32_0 = arith.constant 0 : i32
    %c0_i32_1 = arith.constant 0 : i32
    return %c0_i32, %c0_i32_0 : i32, i32
  }
  func.func @transform_7(%arg0: i32) -> (i32, i32, i32) {
    %c0_i32 = arith.constant 0 : i32
    %c0_i32_0 = arith.constant 0 : i32
    %c0_i32_1 = arith.constant 0 : i32
    return %arg0, %c0_i32, %c0_i32_0 : i32, i32, i32
  }
}

</mosaic_0001>

<bundles_post_ra>
// kernel: tpu_custom_call.1
= control target key start
LH: loop header
LB: loop body
LE: loop exit
PB: predicated region body
PF: predicated region fallthrough
CT: control target
= control target key end

     0   :  { %12 = vsyncpa [#allocation3], 0  ;;  %s6682_s0 = inlined_call_operand.vmem [shape: f32[32,16,8], index: 0, kind: input, shape index: {}]   ;;  %s6683_s1 = inlined_call_operand.vmem [shape: f32[32,8,8], index: 1, kind: input, shape index: {}]   ;;  %s6684_s2 = inlined_call_operand.vmem [shape: f32[32,16,16], index: 2, kind: input, shape index: {}]   ;;  %s6685_s3 = inlined_call_operand.vmem [shape: f32[32,16,16], index: 3, kind: input, shape index: {}]   ;;  %s6686_s4 = inlined_call_operand.vmem [shape: f32[32,8,8], index: 4, kind: input, shape index: {}]   ;;  %s6687_s5 = inlined_call_operand.vmem [shape: bf16[336,32], index: 5, kind: input, shape index: {}]   ;;  %s6688_s6 = inlined_call_operand.vmem [shape: bf16[33,128], index: 6, kind: input, shape index: {}]   ;;  %s6689_s7 = inlined_call_operand.hbm [shape: f32[32,8,128], index: 7, kind: output, shape index: {}]  }
   0x1   :  { %14 = vsyncpa [#allocation3 + $0x1], 0  ;;  %s5195_s24 = smov 0   ;;  %s5197_s25 = smov 0  }
   0x2   :  { %s5199_s26 = smov 0   ;;  %s5201_s27 = smov 0  }
   0x3 LB: > { %s5216_s28 = sadd.s32 4294967295, %s5147_s27   ;;  %s4378_s29 = sadd.s32 4294967294, %s5147_s27   ;;  %s5147_s27 = sphi %s5201_s27, %s6725_s27   ;;  %s5143_s26 = sphi %s5199_s26, %s6724_s26   ;;  %s5139_s25 = sphi %s5197_s25, %s6723_s25   ;;  %s5135_s24 = sphi %s5195_s24, %s6722_s24  }
   0x4   : > { %s5220_s30 = sadd.s32 1, %s5147_s27   ;;  %s199_s8 = sadd.s32 1, %s5143_s26 }
   0x5   : > { %s196_s9 = ssub.s32 %s5147_s27, %s5220_s30  ;;  %p209_p0 = scmp.ne.s32.totalorder %s5143_s26, %s5139_s25 }
   0x6   : > { %p197_p1 = scmp.eq.s32.totalorder %s196_s9, 0  ;;  %p210_p2 = scmp.eq.s32.totalorder %s5216_s28, 1 }
   0x7   : > { %p215_p3 = scmp.ne.s32.totalorder %s5139_s25, %s5135_s24  ;;  %p216_p4 = scmp.eq.s32.totalorder %s4378_s29, 1 }
   0x8   : > { %s5231_s10 = scalar_select %p197_p1, %s5143_s26, %s199_s8  }
   0x9   : > { %p5233_p5 = por %p210_p2, %p209_p0  ;;  %p5237_p6 = por %p216_p4, %p215_p3 }
   0xa   : > { %p4381_p7 = scmp.ge.s32.totalorder %s5147_s27, 1  ;;  %p288_p8 = scmp.lt.s32.totalorder %s5147_s27, 3 }
   0xc   : > { %p289_p9 = pnand %p4381_p7, %p288_p8 }
   0xe   : > { %292 = sbr.rel (%p289_p9) target bundleno = 2084 (0x824), region = 48 }
  0x13   : > { %s4383_s13 = sshll.u32 %s5216_s28, 4  ;;  %vm442_vm0 = vcmask 130048   ;;  %s5149_s21 = smov 8   ;;  %vm1676_vm1 = vcmask 1043456   ;;  %vm1531_vm2 = vcmask 64512   ;;  %vm1627_vm3 = vcmask 195584  }
  0x14   : > { %p344_p10 = scmp.lt.s32.totalorder %s4383_s13, 31  ;;  %s5150_s22 = smov 16   ;;  %vm2377_vm4 = vcmask 261120   ;;  %vm2425_vm5 = vcmask 326656   ;;  %vm2641_vm6 = vcmask 523264   ;;  %vm3979_vm7 = vcmask 785408  }
  0x15   : > { %s5151_s29 = smov 32   ;;  %s4673_s16 = sshll.u32 %s5216_s28, 7 }
  0x16   : > { %s6727_s13 = smov (!%p344_p10, %s4383_s13), 31  ;;  %s4264_s18 = scalar_lea.hbm %s6689_s7, %s4673_s16 }
  0x17   : > { %s5247_s14 = sshll.u32 %s6727_s13, 4 }
  0x18   : > { %s5253_s17 = scalar_lea.vmem %s6682_s0, %s5247_s14  ;;  %s5268_s20 = scalar_lea.vmem %s6684_s2, %s5247_s14 }
  0x19   : > { %v5256_v0 = vld [vmem:[%s5253_s17 + $0x8] sm:$0xff]  ;;  %v5259_v1 = vld [vmem:[%s5253_s17 + $0x18] sm:$0xff]  ;;  %v5273_v3 = vld [vmem:[%s5253_s17] sm:$0xff]  ;;  %s5923_s19 = scalar_lea.vmem %s6685_s3, %s5247_s14  ;;  %s4387_s14 = sshll.u32 %s6727_s13, 3 }
  0x1a   : > { %v5262_v2 = vld [vmem:[%s5253_s17 + $0x28] sm:$0xff]  ;;  %463 = vmatpush.msra.mxu0 %v5256_v0  ;;  %492 = vmatpush.msra.mxu3 %v5259_v1  ;;  %v5276_v4 = vld [vmem:[%s5253_s17 + $0x10] sm:$0xff]  ;;  %v5279_v5 = vld [vmem:[%s5253_s17 + $0x20] sm:$0xff]  ;;  %s5951_s23 = scalar_lea.vmem %s6683_s1, %s4387_s14  ;;  %s6217_s9 = scalar_lea.vmem %s6686_s4, %s4387_s14 }
  0x1b   : > { %4674 = vmatpush.msra.mxu2 %v5262_v2  ;;  %v5283_v6 = vld [vmem:[%s5268_s20] sm:$0xff]  ;;  %v5286_v7 = vld [vmem:[%s5268_s20 + $0x10] sm:$0xff]  ;;  %v5289_v8 = vld [vmem:[%s5268_s20 + $0x28] sm:$0xff]  ;;  %521 = vmatpush.msra.mxu1 %v5262_v2  ;;  %s5152_s13 = smov 64   ;;  %s5153_s14 = smov 96  }
  0x1c   : > { %464 = vmatpush.msra.mxu0 %v5273_v3  ;;  %493 = vmatpush.msra.mxu3 %v5276_v4  ;;  %v5298_v9 = vld [vmem:[%s5268_s20 + $0x20] sm:$0xff]  ;;  %v5301_v10 = vld [vmem:[%s5253_s17 + $0x38] sm:$0xff]  ;;  %v5304_v11 = vld [vmem:[%s5253_s17 + $0x48] sm:$0xff] }
  0x1d   : > { %4675 = vmatpush.msra.mxu2 %v5279_v5  ;;  %4396 = vmatmul.msk.f32.vlgmr.msra.gmra.mxu0 %vm442_vm0, %v5283_v6  ;;  %v5311_v12 = vld [vmem:[%s5253_s17 + $0x30] sm:$0xff]  ;;  %v5316_v13 = vld [vmem:[%s5253_s17 + $0x40] sm:$0xff]  ;;  %v5319_v14 = vld [vmem:[%s5253_s17 + $0x58] sm:$0xff] }
  0x1e   : > { %4398 = vmatmul.msk.f32.vlgmr.msra.gmra.mxu3 %vm442_vm0, %v5286_v7  ;;  %4401 = vmatmul.msk.f32.vlgmr.msra.gmra.mxu2 %vm442_vm0, %v5289_v8  ;;  %v5325_v15 = vld [vmem:[%s5253_s17 + $0x50] sm:$0xff]  ;;  %v5328_v16 = vld [vmem:[%s5253_s17 + $0x68] sm:$0xff]  ;;  %v5333_v17 = vld [vmem:[%s5253_s17 + $0x78] sm:$0xff] }
  0x1f   : > { %522 = vmatpush.msra.mxu1 %v5279_v5  ;;  %550 = vmatpush.msrb.mxu3 %v5301_v10  ;;  %6702 = vst [vmem:[#allocation5_spill] sm:$0xff] %v5333_v17  ;;  %v5336_v18 = vld [vmem:[%s5253_s17 + $0x60] sm:$0xff]  ;;  %v5339_v19 = vld [vmem:[%s5268_s20 + $0x8] sm:$0xff]  ;;  %v5344_v20 = vld [vmem:[%s5253_s17 + $0x70] sm:$0xff] }
  0x20   : > { %4400 = vmatmul.msk.f32.vlgmr.msra.gmra.mxu1 %vm442_vm0, %v5298_v9  ;;  %579 = vmatpush.msrb.mxu0 %v5304_v11  ;;  %6703 = vst [vmem:[#allocation6_spill] sm:$0xff] %v5344_v20  ;;  %v5347_v21 = vld [vmem:[%s5268_s20 + $0x18] sm:$0xff]  ;;  %v5352_v22 = vld [vmem:[%s5268_s20 + $0x60] sm:$0xff]  ;;  %v5358_v23 = vld [vmem:[%s5268_s20 + $0x50] sm:$0xff] }
  0x21   : > { %551 = vmatpush.msrb.mxu3 %v5311_v12  ;;  %608 = vmatpush.msrb.mxu1 %v5319_v14  ;;  %v5368_v24 = vld [vmem:[%s5268_s20 + $0x40] sm:$0xff]  ;;  %v5371_v25 = vld [vmem:[%s5268_s20 + $0x30] sm:$0xff]  ;;  %v5374_v26 = vld [vmem:[%s5268_s20 + $0x68] sm:$0xff] }
  0x22   : > { %580 = vmatpush.msrb.mxu0 %v5316_v13  ;;  %637 = vmatpush.msrb.mxu2 %v5328_v16  ;;  %v5377_v27 = vld [vmem:[%s5253_s17 + $0xb8] sm:$0xff]  ;;  %v5389_v29 = vld [vmem:[%s5253_s17 + $0xb0] sm:$0xff]  ;;  %v5392_v30 = vld [vmem:[%s5253_s17 + $0x88] sm:$0xff] }
  0x23   : > { %609 = vmatpush.msrb.mxu1 %v5325_v15  ;;  %666 = vmatpush.msra.mxu3 %v5333_v17  ;;  %v5382_v28 = vld [vmem:[%s5268_s20 + $0x58] sm:$0xff]  ;;  %6704 = vst [vmem:[#allocation7_spill] sm:$0xff] %v5392_v30  ;;  %v5395_v31 = vld [vmem:[%s5253_s17 + $0x80] sm:$0xff]  ;;  %v5404_v32 = vld [vmem:[%s5268_s20 + $0x48] sm:$0xff] }
  0x24   : > { %638 = vmatpush.msrb.mxu2 %v5336_v18  ;;  %6705 = vst [vmem:[#allocation8_spill] sm:$0xff] %v5395_v31  ;;  %695 = vmatpush.msra.mxu0 %v5392_v30  ;;  %v5407_v33 = vld [vmem:[%s5268_s20 + $0x38] sm:$0xff]  ;;  %v5417_v35 = vld [vmem:[%s5253_s17 + $0x90] sm:$0xff]  ;;  %v5428_v38 = vld [vmem:[%s5253_s17 + $0xa8] sm:$0xff] }
  0x25   : > { %4397 = vmatmul.msk.f32.gmra.mxu0 %vm442_vm0, %v5339_v19  ;;  %667 = vmatpush.msra.mxu3 %v5344_v20  ;;  %v5414_v34 = vld [vmem:[%s5253_s17 + $0x98] sm:$0xff]  ;;  %6707 = vst [vmem:[#allocation10_spill] sm:$0xff] %v5417_v35  ;;  %v5421_v36 = vld [vmem:[%s5268_s20 + $0x90] sm:$0xff]  ;;  %v5431_v39 = vld [vmem:[%s5253_s17 + $0xa0] sm:$0xff] }
  0x26   : > { %4399 = vmatmul.msk.f32.gmra.mxu3 %vm442_vm0, %v5347_v21  ;;  %4408 = vmatmul.msk.f32.vlgmr.msrb.gmra.mxu2 %vm442_vm0, %v5352_v22  ;;  %6706 = vst [vmem:[#allocation9_spill] sm:$0xff] %v5414_v34  ;;  %v5424_v37 = vld [vmem:[%s5253_s17 + $0xd8] sm:$0xff]  ;;  %v5434_v40 = vld [vmem:[%s5268_s20 + $0x80] sm:$0xff]  ;;  %v5439_v41 = vld [vmem:[%s5253_s17 + $0xd0] sm:$0xff] }
  0x27   : > { %696 = vmatpush.msra.mxu0 %v5395_v31  ;;  %724 = vmatpush.msra.mxu1 %v5414_v34  ;;  %6708 = vst [vmem:[#allocation11_spill] sm:$0xff] %v5428_v38  ;;  %v5443_v42 = vld [vmem:[%s5268_s20 + $0x70] sm:$0xff]  ;;  %v5447_v43 = vld [vmem:[%s5253_s17 + $0xf8] sm:$0xff]  ;;  %v5459_v45 = vld [vmem:[%s5268_s20 + $0xa0] sm:$0xff] }
  0x28   : > { %4406 = vmatmul.msk.f32.vlgmr.msrb.gmra.mxu1 %vm442_vm0, %v5358_v23  ;;  %6709 = vst [vmem:[#allocation12_spill] sm:$0xff] %v5431_v39  ;;  %753 = vmatpush.msra.mxu2 %v5428_v38  ;;  %v5456_v44 = vld [vmem:[%s5253_s17 + $0xf0] sm:$0xff]  ;;  %v5462_v46 = vld [vmem:[%s5253_s17 + $0xc8] sm:$0xff]  ;;  %v5465_v47 = vld [vmem:[%s5268_s20 + $0x98] sm:$0xff] }
  0x29   : > { %725 = vmatpush.msra.mxu1 %v5417_v35  ;;  %6710 = vst [vmem:[#allocation13_spill] sm:$0xff] %v5447_v43  ;;  %v5471_v48 = vld [vmem:[%s5253_s17 + $0xc0] sm:$0xff]  ;;  %v5476_v49 = vld [vmem:[%s5268_s20 + $0x88] sm:$0xff]  ;;  %v5482_v50 = vld [vmem:[%s5268_s20 + $0x78] sm:$0xff] }
  0x2a   : > { %754 = vmatpush.msra.mxu2 %v5431_v39  ;;  %6711 = vst [vmem:[#allocation14_spill] sm:$0xff] %v5456_v44  ;;  %v5489_v51 = vld [vmem:[%s5268_s20 + $0xa8] sm:$0xff]  ;;  %v5495_v53 = vld [vmem:[%s5268_s20 + $0xd0] sm:$0xff]  ;;  %v5500_v54 = vld [vmem:[%s5253_s17 + $0xe0] sm:$0xff] }
  0x2b   : > { %840 = vmatpush.msrb.mxu1 %v5424_v37  ;;  %v5492_v52 = vld [vmem:[%s5253_s17 + $0xe8] sm:$0xff]  ;;  %v5506_v55 = vld [vmem:[%s5268_s20 + $0xc0] sm:$0xff]  ;;  %v5510_v56 = vld [vmem:[%s5268_s20 + $0xb0] sm:$0xff] }
  0x2c   : > { %869 = vmatpush.msrb.mxu2 %v5492_v52  ;;  %v5513_v57 = vld [vmem:[%s5268_s20 + $0xe0] sm:$0xff]  ;;  %v5520_v58 = vld [vmem:[%s5268_s20 + $0xd8] sm:$0xff]  ;;  %v5527_v59 = vld [vmem:[%s5268_s20 + $0xc8] sm:$0xff] }
  0x2d   : > { %4404 = vmatmul.msk.f32.vlgmr.msrb.gmra.mxu0 %vm442_vm0, %v5368_v24  ;;  %841 = vmatpush.msrb.mxu1 %v5439_v41  ;;  %v5530_v60 = vld [vmem:[%s5268_s20 + $0xb8] sm:$0xff]  ;;  %v5533_v61 = vld [vmem:[%s5268_s20 + $0xe8] sm:$0xff]  ;;  %v5542_v62 = vld [vmem:[%s5268_s20 + $0xf0] sm:$0xff] }
  0x2e   : > { %4402 = vmatmul.msk.f32.vlgmr.msrb.gmra.mxu3 %vm442_vm0, %v5371_v25  ;;  %4409 = vmatmul.msk.f32.gmra.mxu2 %vm442_vm0, %v5374_v26  ;;  %v5547_v63 = vld [vmem:[%s5268_s20 + $0xf8] sm:$0xff] }
  0x2f   : > { %782 = vmatpush.msrb.mxu3 %v5377_v27  ;;  %811 = vmatpush.msrb.mxu0 %v5462_v46 }
  0x30   : > { %4407 = vmatmul.msk.f32.gmra.mxu1 %vm442_vm0, %v5382_v28  ;;  %870 = vmatpush.msrb.mxu2 %v5500_v54 }
  0x31   : > { %783 = vmatpush.msrb.mxu3 %v5389_v29  ;;  %812 = vmatpush.msrb.mxu0 %v5471_v48 }
  0x35   : > { %4405 = vmatmul.msk.f32.gmra.mxu0 %vm442_vm0, %v5404_v32 }
  0x36   : > { %4403 = vmatmul.msk.f32.gmra.mxu3 %vm442_vm0, %v5407_v33  ;;  %4416 = vmatmul.msk.f32.vlgmr.msra.gmra.mxu2 %vm442_vm0, %v5459_v45 }
  0x38   : > { %4414 = vmatmul.msk.f32.vlgmr.msra.gmra.mxu1 %vm442_vm0, %v5421_v36 }
  0x3d   : > { %4412 = vmatmul.msk.f32.vlgmr.msra.gmra.mxu0 %vm442_vm0, %v5434_v40 }
  0x3e   : > { %4410 = vmatmul.msk.f32.vlgmr.msra.gmra.mxu3 %vm442_vm0, %v5443_v42  ;;  %4417 = vmatmul.msk.f32.gmra.mxu2 %vm442_vm0, %v5489_v51 }
  0x3f   : > { %898 = vmatpush.msra.mxu3 %v5447_v43 }
  0x40   : > { %4415 = vmatmul.msk.f32.gmra.mxu1 %vm442_vm0, %v5465_v47 }
  0x41   : > { %899 = vmatpush.msra.mxu3 %v5456_v44 }
  0x45   : > { %4413 = vmatmul.msk.f32.gmra.mxu0 %vm442_vm0, %v5476_v49 }
  0x46   : > { %4411 = vmatmul.msk.f32.gmra.mxu3 %vm442_vm0, %v5482_v50  ;;  %4424 = vmatmul.msk.f32.vlgmr.msrb.gmra.mxu2 %vm442_vm0, %v5513_v57 }
  0x48   : > { %4422 = vmatmul.msk.f32.vlgmr.msrb.gmra.mxu1 %vm442_vm0, %v5495_v53 }
  0x4d   : > { %4420 = vmatmul.msk.f32.vlgmr.msrb.gmra.mxu0 %vm442_vm0, %v5506_v55 }
  0x4e   : > { %4418 = vmatmul.msk.f32.vlgmr.msrb.gmra.mxu3 %vm442_vm0, %v5510_v56  ;;  %4425 = vmatmul.msk.f32.gmra.mxu2 %vm442_vm0, %v5533_v61 }
  0x50   : > { %4423 = vmatmul.msk.f32.gmra.mxu1 %vm442_vm0, %v5520_v58 }
  0x55   : > { %4421 = vmatmul.msk.f32.gmra.mxu0 %vm442_vm0, %v5527_v59 }
  0x56   : > { %4419 = vmatmul.msk.f32.gmra.mxu3 %vm442_vm0, %v5530_v60 }
  0x5e   : > { %4426 = vmatmul.msk.f32.vlgmr.msra.gmra.mxu3 %vm442_vm0, %v5542_v62 }
  0x66   : > { %4427 = vmatmul.msk.f32.gmra.mxu3 %vm442_vm0, %v5547_v63 }
  0x9a   : > { %v466_v39 = vpop.f32.mrf.mxu0 }
  0x9d   : > { %v524_v38 = vpop.f32.mrf.mxu1 }
  0xa1   : > { %v495_v35 = vpop.f32.mrf.mxu3  ;;  %v527_v34 = vpop.f32.mrf.mxu2 }
  0xa2   : > { %967 = vmatpush.msra.mxu2 %v527_v34  ;;  %v469_v31 = vpop.f32.mrf.mxu0 }
  0xa3   : > { %921 = vmatpush.msra.mxu0 %v469_v31  ;;  %v4725_v30 = vpack.i.bf16 %v469_v31, %v466_v39 }
  0xa4   : > { %968 = vmatpush.msra.mxu2 %v524_v38 }
  0xa5   : > { %4432 = vmatmul.msk.f32.vlgmr.msra.gmra.mxu2 %vm442_vm0, %v5298_v9  ;;  %4726 = vrot.lane.b32.xlu0 %v4725_v30, %s5149_s21  ;;  %v5554_v44 = vpop.f32.mrf.mxu1 }
  0xa6   : > { %922 = vmatpush.msra.mxu0 %v466_v39 }
  0xa7   : > { %4428 = vmatmul.msk.f32.vlgmr.msra.gmra.mxu0 %vm442_vm0, %v5283_v6 }
  0xa9   : > { %v498_v43 = vpop.f32.mrf.mxu3  ;;  %v5558_v20 = vpop.f32.mrf.mxu2 }
  0xaa   : > { %944 = vmatpush.msra.mxu1 %v498_v43  ;;  %v5560_v17 = vpop.f32.mrf.mxu0  ;;  %v4735_v31 = vpack.i.bf16 %v498_v43, %v495_v35 }
  0xac   : > { %945 = vmatpush.msra.mxu1 %v495_v35  ;;  %4736 = vrot.lane.b32.xlu1 %v4735_v31, %s5149_s21 }
  0xad   : > { %4430 = vmatmul.msk.f32.vlgmr.msra.gmra.mxu1 %vm442_vm0, %v5286_v7  ;;  %4433 = vmatmul.msk.f32.gmra.mxu2 %vm442_vm0, %v5289_v8  ;;  %v5567_v9 = vpop.f32.mrf.mxu1  ;;  %v4745_v7 = vpack.i.bf16 %v527_v34, %v524_v38 }
  0xae   : > { %1036 = vmatpush.msrb.mxu1 %v5567_v9 }
  0xaf   : > { %4429 = vmatmul.msk.f32.gmra.mxu0 %vm442_vm0, %v5339_v19  ;;  %4746 = vrot.lane.b32.xlu2 %v4745_v7, %s5149_s21 }
  0xb0   : > { %1037 = vmatpush.msrb.mxu1 %v5554_v44 }
  0xb1   : > { %v5573_v6 = vpop.f32.mrf.mxu3  ;;  %v5575_v30 = vpop.f32.mrf.mxu2 }
  0xb2   : > { %v5577_v35 = vpop.f32.mrf.mxu0  ;;  %1059 = vmatpush.msrb.mxu2 %v5575_v30 }
  0xb3   : > { %1013 = vmatpush.msrb.mxu0 %v5577_v35 }
  0xb4   : > { %1060 = vmatpush.msrb.mxu2 %v5558_v20 }
  0xb5   : > { %4431 = vmatmul.msk.f32.gmra.mxu1 %vm442_vm0, %v5347_v21  ;;  %1014 = vmatpush.msrb.mxu0 %v5560_v17  ;;  %v5589_v8 = vpop.f32.mrf.mxu1 }
  0xb6   : > { %4440 = vmatmul.msk.f32.vlgmr.msrb.gmra.mxu2 %vm442_vm0, %v5352_v22 }
  0xb7   : > { %4436 = vmatmul.msk.f32.vlgmr.msrb.gmra.mxu0 %vm442_vm0, %v5368_v24 }
  0xb9   : > { %v5592_v19 = vpop.f32.mrf.mxu3 }
  0xba   : > { %990 = vmatpush.msrb.mxu3 %v5592_v19  ;;  %v5595_v39 = vpop.f32.mrf.mxu0 }
  0xbc   : > { %991 = vmatpush.msrb.mxu3 %v5573_v6 }
  0xbd   : > { %4434 = vmatmul.msk.f32.vlgmr.msrb.gmra.mxu3 %vm442_vm0, %v5371_v25  ;;  %4438 = vmatmul.msk.f32.vlgmr.msrb.gmra.mxu1 %vm442_vm0, %v5358_v23  ;;  %v5606_v21 = vpop.f32.mrf.mxu1  ;;  %v5619_v23 = vpop.f32.mrf.mxu2 }
  0xbe   : > { %4441 = vmatmul.msk.f32.gmra.mxu2 %vm442_vm0, %v5374_v26  ;;  %1128 = vmatpush.msra.mxu1 %v5606_v21 }
  0xbf   : > { %4437 = vmatmul.msk.f32.gmra.mxu0 %vm442_vm0, %v5404_v32 }
  0xc0   : > { %1129 = vmatpush.msra.mxu1 %v5589_v8 }
  0xc1   : > { %v5609_v22 = vpop.f32.mrf.mxu3 }
  0xc2   : > { %v5611_v24 = vpop.f32.mrf.mxu0 }
  0xc3   : > { %1105 = vmatpush.msra.mxu0 %v5611_v24 }
  0xc5   : > { %4435 = vmatmul.msk.f32.gmra.mxu3 %vm442_vm0, %v5407_v33  ;;  %4439 = vmatmul.msk.f32.gmra.mxu1 %vm442_vm0, %v5382_v28  ;;  %v5624_v25 = vpop.f32.mrf.mxu1  ;;  %v5636_v28 = vpop.f32.mrf.mxu2 }
  0xc6   : > { %1106 = vmatpush.msra.mxu0 %v5595_v39  ;;  %1151 = vmatpush.msra.mxu2 %v5636_v28 }
  0xc7   : > { %4444 = vmatmul.msk.f32.vlgmr.msra.gmra.mxu0 %vm442_vm0, %v5434_v40 }
  0xc8   : > { %1152 = vmatpush.msra.mxu2 %v5619_v23 }
  0xc9   : > { %v5626_v26 = vpop.f32.mrf.mxu3  ;;  %4448 = vmatmul.msk.f32.vlgmr.msra.gmra.mxu2 %vm442_vm0, %v5459_v45 }
  0xca   : > { %1082 = vmatpush.msra.mxu3 %v5626_v26  ;;  %v5629_v32 = vpop.f32.mrf.mxu0 }
  0xcc   : > { %1083 = vmatpush.msra.mxu3 %v5609_v22 }
  0xcd   : > { %4442 = vmatmul.msk.f32.vlgmr.msra.gmra.mxu3 %vm442_vm0, %v5443_v42  ;;  %4446 = vmatmul.msk.f32.vlgmr.msra.gmra.mxu1 %vm442_vm0, %v5421_v36  ;;  %v5641_v33 = vpop.f32.mrf.mxu1  ;;  %v5657_v38 = vpop.f32.mrf.mxu2 }
  0xce   : > { %1220 = vmatpush.msrb.mxu1 %v5641_v33 }
  0xcf   : > { %4445 = vmatmul.msk.f32.gmra.mxu0 %vm442_vm0, %v5476_v49 }
  0xd0   : > { %1221 = vmatpush.msrb.mxu1 %v5624_v25 }
  0xd1   : > { %v5645_v34 = vpop.f32.mrf.mxu3  ;;  %4449 = vmatmul.msk.f32.gmra.mxu2 %vm442_vm0, %v5489_v51 }
  0xd2   : > { %v5650_v36 = vpop.f32.mrf.mxu0 }
  0xd3   : > { %1197 = vmatpush.msrb.mxu0 %v5650_v36 }
  0xd5   : > { %4443 = vmatmul.msk.f32.gmra.mxu3 %vm442_vm0, %v5482_v50  ;;  %4447 = vmatmul.msk.f32.gmra.mxu1 %vm442_vm0, %v5465_v47  ;;  %v5669_v42 = vpop.f32.mrf.mxu2 }
  0xd6   : > { %1198 = vmatpush.msrb.mxu0 %v5629_v32  ;;  %1243 = vmatpush.msrb.mxu2 %v5669_v42 }
  0xd7   : > { %4452 = vmatmul.msk.f32.vlgmr.msrb.gmra.mxu0 %vm442_vm0, %v5506_v55 }
  0xd8   : > { %1244 = vmatpush.msrb.mxu2 %v5657_v38 }
  0xd9   : > { %v788_v40 = vpop.f32.mrf.mxu3  ;;  %4456 = vmatmul.msk.f32.vlgmr.msrb.gmra.mxu2 %vm442_vm0, %v5513_v57 }
  0xda   : > { %1174 = vmatpush.msrb.mxu3 %v788_v40 }
  0xdc   : > { %1175 = vmatpush.msrb.mxu3 %v5645_v34 }
  0xdd   : > { %4450 = vmatmul.msk.f32.vlgmr.msrb.gmra.mxu3 %vm442_vm0, %v5510_v56  ;;  %4454 = vmatmul.msk.f32.vlgmr.msrb.gmra.mxu1 %vm442_vm0, %v5495_v53 }
  0xdf   : > { %4453 = vmatmul.msk.f32.gmra.mxu0 %vm442_vm0, %v5527_v59 }
  0xe1   : > { %v5675_v43 = vpop.f32.mrf.mxu3  ;;  %4457 = vmatmul.msk.f32.gmra.mxu2 %vm442_vm0, %v5533_v61  ;;  %v4765_v61 = vpack.i.bf16 %v5577_v35, %v5560_v17 }
  0xe5   : > { %4451 = vmatmul.msk.f32.gmra.mxu3 %vm442_vm0, %v5530_v60  ;;  %4455 = vmatmul.msk.f32.gmra.mxu1 %vm442_vm0, %v5520_v58  ;;  %v4755_v60 = vpack.i.bf16 %v5592_v19, %v5573_v6  ;;  %v4785_v6 = vpack.i.bf16 %v5575_v30, %v5558_v20  ;;  %v4810_v20 = vpack.i.bf16 %v788_v40, %v5645_v34 }
  0xe9   : > { %v5683_v45 = vpop.f32.mrf.mxu3 }
  0xea   : > { %1266 = vmatpush.msra.mxu3 %v5683_v45 }
  0xec   : > { %1267 = vmatpush.msra.mxu3 %v5675_v43 }
  0xed   : > { %4458 = vmatmul.msk.f32.vlgmr.msra.gmra.mxu3 %vm442_vm0, %v5542_v62 }
  0xf5   : > { %4459 = vmatmul.msk.f32.gmra.mxu3 %vm442_vm0, %v5547_v63 }
 0x124   : > { %v924_v47 = vpop.f32.mrf.mxu0 }
 0x128   : > { %v970_v49 = vpop.f32.mrf.mxu2 }
 0x12a   : > { %v947_v50 = vpop.f32.mrf.mxu1 }
 0x12c   : > { %v927_v51 = vpop.f32.mrf.mxu0 }
 0x12d   : > { %v4730_v53 = vpack.i.bf16 %v927_v51, %v924_v47  ;;  %v4795_v51 = vpack.i.bf16 %v5626_v26, %v5609_v22 }
 0x12f   : > { %4731 = vrot.lane.b32.xlu0 %v4730_v53, %s5150_s22 }
 0x130   : > { %v973_v55 = vpop.f32.mrf.mxu2 }
 0x131   : > { %v4750_v56 = vpack.i.bf16 %v973_v55, %v970_v49 }
 0x132   : > { %v950_v57 = vpop.f32.mrf.mxu1 }
 0x133   : > { %v4740_v58 = vpack.i.bf16 %v950_v57, %v947_v50  ;;  %4751 = vrot.lane.b32.xlu2 %v4750_v56, %s5150_s22  ;;  %v4775_v56 = vpack.i.bf16 %v5567_v9, %v5554_v44 }
 0x134   : > { %v1016_v59 = vpop.f32.mrf.mxu0 }
 0x135   : > { %4741 = vrot.lane.b32.xlu1 %v4740_v58, %s5150_s22 }
 0x137   : > { %4756 = vrot.lane.b32.xlu0 %v4755_v60, %s5149_s21  ;;  %v4825_v60 = vpack.i.bf16 %v5606_v21, %v5589_v8 }
 0x139   : > { %v1062_v35 = vpop.f32.mrf.mxu2 }
 0x13a   : > { %v1039_v62 = vpop.f32.mrf.mxu1 }
 0x13b   : > { %4766 = vrot.lane.b32.xlu2 %v4765_v61, %s5149_s21 }
 0x13c   : > { %v1019_v63 = vpop.f32.mrf.mxu0 }
 0x13d   : > { %v4770_v31 = vpack.i.bf16 %v1019_v63, %v1016_v59 }
 0x13f   : > { %4771 = vrot.lane.b32.xlu0 %v4770_v31, %s5150_s22  ;;  %v4830_v31 = vpack.i.bf16 %v5650_v36, %v5629_v32 }
 0x140   : > { %v993_v7 = vpop.f32.mrf.mxu3 }
 0x141   : > { %v1065_v30 = vpop.f32.mrf.mxu2 }
 0x142   : > { %v1042_v47 = vpop.f32.mrf.mxu1  ;;  %v4790_v59 = vpack.i.bf16 %v1065_v30, %v1062_v35  ;;  %v4727_v30 = vpop.permute.xlu0 %4726 }
 0x143   : > { %v4780_v49 = vpack.i.bf16 %v1042_v47, %v1039_v62  ;;  %v4805_v62 = vpack.i.bf16 %v5611_v24, %v5595_v39 }
 0x144   : > { %v1108_v50 = vpop.f32.mrf.mxu0 }
 0x145   : > { %4781 = vrot.lane.b32.xlu2 %v4780_v49, %s5150_s22 }
 0x147   : > { %4786 = vrot.lane.b32.xlu0 %v4785_v6, %s5149_s21 }
 0x148   : > { %v996_v19 = vpop.f32.mrf.mxu3 }
 0x149   : > { %v4760_v17 = vpack.i.bf16 %v996_v19, %v993_v7  ;;  %v4850_v19 = vpack.i.bf16 %v5641_v33, %v5624_v25  ;;  %v4875_v25 = vpack.i.bf16 %v5683_v45, %v5675_v43  ;;  %v4865_v33 = vpack.i.bf16 %v5669_v42, %v5657_v38 }
 0x14a   : > { %v1131_v58 = vpop.f32.mrf.mxu1  ;;  %v4728_v43 = vunpack.i.l.bf16 %v4727_v30 }
 0x14b   : > { %4761 = vrot.lane.b32.xlu1 %v4760_v17, %s5150_s22 }
 0x14c   : > { %v1111_v53 = vpop.f32.mrf.mxu0  ;;  %v1154_v44 = vpop.f32.mrf.mxu2 }
 0x14d   : > { %4796 = vrot.lane.b32.xlu2 %v4795_v51, %s5149_s21  ;;  %v4815_v34 = vpack.i.bf16 %v1111_v53, %v1108_v50  ;;  %v4845_v50 = vpack.i.bf16 %v5636_v28, %v5619_v23  ;;  %v1598_v51 = vld [vmem:[%s6687_s5 + $0x8] sm:$0xf] }
 0x14e   : > { %v1623_v23 = vunpack.c.l.b16 %v1598_v51 }
 0x150   : > { %v1085_v55 = vpop.f32.mrf.mxu3  ;;  %v1625_v28 = vpack.c.b16 %v1623_v23, %v1623_v23 }
 0x152   : > { %v1134_v61 = vpop.f32.mrf.mxu1  ;;  %v1678_v53 = vsel %vm1676_vm1, %v1625_v28, 0 }
 0x153   : > { %4776 = vrot.lane.b32.xlu1 %v4775_v56, %s5149_s21  ;;  %v4835_v24 = vpack.i.bf16 %v1134_v61, %v1131_v58  ;;  %1686 = vmatpush.bf16.msra.mxu0 %v1678_v53 }
 0x154   : > { %v1200_v57 = vpop.f32.mrf.mxu0  ;;  %v1157_v8 = vpop.f32.mrf.mxu2  ;;  %4676 = vmatpush.bf16.msra.mxu2 %v1678_v53 }
 0x155   : > { %4811 = vrot.lane.b32.xlu2 %v4810_v20, %s5149_s21  ;;  %v4855_v47 = vpack.i.bf16 %v1157_v8, %v1154_v44 }
 0x158   : > { %v1088_v22 = vpop.f32.mrf.mxu3 }
 0x159   : > { %v4800_v26 = vpack.i.bf16 %v1088_v22, %v1085_v55  ;;  %v4656_v55 = vld [vmem:[%s6687_s5] sm:$0xff]  ;;  %v4737_v22 = vpop.permute.xlu1 %4736 }
 0x15a   : > { %v1223_v49 = vpop.f32.mrf.mxu1  ;;  %1687 = vmatpush.bf16.msra.mxu0 %v4656_v55  ;;  %4677 = vmatpush.bf16.msra.mxu2 %v4656_v55  ;;  %v4738_v61 = vunpack.i.l.bf16 %v4737_v22 }
 0x15b   : > { %4791 = vrot.lane.b32.xlu1 %v4790_v59, %s5150_s22  ;;  %4801 = vrot.lane.b32.xlu0 %v4800_v26, %s5150_s22  ;;  %v1532_v59 = vsel %vm1531_vm2, %v5273_v3, %v4728_v43 }
 0x15c   : > { %v1203_v9 = vpop.f32.mrf.mxu0  ;;  %v1246_v39 = vpop.f32.mrf.mxu2  ;;  %v1534_v3 = vsel %vm1531_vm2, %v5276_v4, %v4738_v61 }
 0x15d   : > { %4826 = vrot.lane.b32.xlu2 %v4825_v60, %s5149_s21  ;;  %v4840_v63 = vpack.i.bf16 %v1203_v9, %v1200_v57  ;;  %v4729_v57 = vunpack.i.h.bf16 %v4727_v30  ;;  %v4747_v9 = vpop.permute.xlu2 %4746 }
 0x15f   : > { %v1533_v58 = vsel %vm1531_vm2, %v5256_v0, %v4729_v57 }
 0x160   : > { %v1177_v40 = vpop.f32.mrf.mxu3 }
 0x162   : > { %v1226_v6 = vpop.f32.mrf.mxu1 }
 0x163   : > { %4806 = vrot.lane.b32.xlu1 %v4805_v62, %s5149_s21  ;;  %4816 = vrot.lane.b32.xlu0 %v4815_v34, %s5150_s22  ;;  %v4860_v32 = vpack.i.bf16 %v1226_v6, %v1223_v49 }
 0x164   : > { %v1249_v36 = vpop.f32.mrf.mxu2 }
 0x165   : > { %4841 = vrot.lane.b32.xlu2 %v4840_v63, %s5150_s22  ;;  %v4870_v17 = vpack.i.bf16 %v1249_v36, %v1246_v39  ;;  %v4749_v39 = vunpack.i.h.bf16 %v4747_v9 }
 0x168   : > { %v1180_v21 = vpop.f32.mrf.mxu3 }
 0x169   : > { %v4820_v7 = vpack.i.bf16 %v1180_v21, %v1177_v40  ;;  %v4739_v40 = vunpack.i.h.bf16 %v4737_v22 }
 0x16b   : > { %4821 = vrot.lane.b32.xlu1 %v4820_v7, %s5150_s22  ;;  %4831 = vrot.lane.b32.xlu0 %v4830_v31, %s5149_s21  ;;  %v1535_v0 = vsel %vm1531_vm2, %v5259_v1, %v4739_v40  ;;  %v1537_v1 = vsel %vm1531_vm2, %v5262_v2, %v4749_v39 }
 0x16d   : > { %4856 = vrot.lane.b32.xlu2 %v4855_v47, %s5150_s22 }
 0x170   : > { %v1269_v35 = vpop.f32.mrf.mxu3 }
 0x173   : > { %4836 = vrot.lane.b32.xlu1 %v4835_v24, %s5150_s22  ;;  %4846 = vrot.lane.b32.xlu0 %v4845_v50, %s5149_s21  ;;  %v4748_v24 = vunpack.i.l.bf16 %v4747_v9 }
 0x175   : > { %4871 = vrot.lane.b32.xlu2 %v4870_v17, %s5150_s22  ;;  %v1536_v4 = vsel %vm1531_vm2, %v5279_v5, %v4748_v24 }
 0x178   : > { %v1272_v56 = vpop.f32.mrf.mxu3 }
 0x179   : > { %v4880_v20 = vpack.i.bf16 %v1272_v56, %v1269_v35 }
 0x17b   : > { %4851 = vrot.lane.b32.xlu1 %v4850_v19, %s5149_s21  ;;  %4861 = vrot.lane.b32.xlu0 %v4860_v32, %s5150_s22 }
 0x183   : > { %4866 = vrot.lane.b32.xlu1 %v4865_v33, %s5149_s21  ;;  %4876 = vrot.lane.b32.xlu0 %v4875_v25, %s5149_s21 }
 0x18b   : > { %4881 = vrot.lane.b32.xlu1 %v4880_v20, %s5150_s22 }
 0x18d   : > { %v4752_v8 = vpop.permute.xlu2 %4751 }
 0x18e   : > { %v4754_v32 = vunpack.i.h.bf16 %v4752_v8  ;;  %v4753_v36 = vunpack.i.l.bf16 %v4752_v8 }
 0x190   : > { %v1568_v17 = vsel %vm442_vm0, %v1536_v4, %v4753_v36  ;;  %v1569_v35 = vsel %vm442_vm0, %v1537_v1, %v4754_v32 }
 0x191   : > { %v1601_v23 = vpack.c.bf16 %v1569_v35, %v1568_v17 }
 0x195   : > { %v4767_v49 = vpop.permute.xlu2 %4766 }
 0x19f   : > { %v5772_v19 = vpop.permute.xlu2 %4781 }
 0x1a0   : > { %v4784_v4 = vunpack.i.h.bf16 %v5772_v19  ;;  %v4783_v17 = vunpack.i.l.bf16 %v5772_v19 }
 0x1a1   : > { %v4732_v45 = vpop.permute.xlu0 %4731 }
 0x1a2   : > { %v4734_v38 = vunpack.i.h.bf16 %v4732_v45  ;;  %v4733_v42 = vunpack.i.l.bf16 %v4732_v45 }
 0x1a4   : > { %v1565_v26 = vsel %vm442_vm0, %v1533_v58, %v4734_v38  ;;  %v1564_v60 = vsel %vm442_vm0, %v1532_v59, %v4733_v42 }
 0x1a5   : > { %v1599_v44 = vpack.c.bf16 %v1565_v26, %v1564_v60  ;;  %v4769_v26 = vunpack.i.h.bf16 %v4767_v49  ;;  %v4768_v60 = vunpack.i.l.bf16 %v4767_v49 }
 0x1a7   : > { %4464 = vmatmul.msk.bf16.vlgmr.msra.gmra.mxu0 %vm1627_vm3, %v1599_v44  ;;  %v4742_v34 = vpop.permute.xlu1 %4741  ;;  %v5779_v53 = vpop.permute.xlu2 %4796 }
 0x1a8   : > { %v4744_v62 = vunpack.i.h.bf16 %v4742_v34  ;;  %v4743_v63 = vunpack.i.l.bf16 %v4742_v34 }
 0x1a9   : > { %v4757_v7 = vpop.permute.xlu0 %4756 }
 0x1aa   : > { %v1566_v21 = vsel %vm442_vm0, %v1534_v3, %v4743_v63  ;;  %v1567_v31 = vsel %vm442_vm0, %v1535_v0, %v4744_v62  ;;  %v4759_v25 = vunpack.i.h.bf16 %v4757_v7  ;;  %v4758_v33 = vunpack.i.l.bf16 %v4757_v7 }
 0x1ab   : > { %v1600_v47 = vpack.c.bf16 %v1567_v31, %v1566_v21  ;;  %v1541_v0 = vsel %vm1531_vm2, %v5304_v11, %v4769_v26  ;;  %v1540_v3 = vsel %vm1531_vm2, %v5316_v13, %v4768_v60 }
 0x1ac   : > { %v1539_v20 = vsel %vm1531_vm2, %v5301_v10, %v4759_v25  ;;  %v1538_v30 = vsel %vm1531_vm2, %v5311_v12, %v4758_v33 }
 0x1af   : > { %v4812_v45 = vpop.permute.xlu2 %4811 }
 0x1b0   : > { %v4814_v59 = vunpack.i.h.bf16 %v4812_v45  ;;  %v4813_v22 = vunpack.i.l.bf16 %v4812_v45 }
 0x1b1   : > { %v4772_v50 = vpop.permute.xlu0 %4771 }
 0x1b2   : > { %v4774_v44 = vunpack.i.h.bf16 %v4772_v50  ;;  %v4773_v9 = vunpack.i.l.bf16 %v4772_v50  ;;  %v1555_v40 = vsel %vm1531_vm2, %v5377_v27, %v4814_v59  ;;  %v1554_v61 = vsel %vm1531_vm2, %v5389_v29, %v4813_v22 }
 0x1b4   : > { %v1573_v31 = vsel %vm442_vm0, %v1541_v0, %v4774_v44  ;;  %v1572_v27 = vsel %vm442_vm0, %v1540_v3, %v4773_v9  ;;  %v4799_v0 = vunpack.i.h.bf16 %v5779_v53  ;;  %v4798_v3 = vunpack.i.l.bf16 %v5779_v53 }
 0x1b5   : > { %v1603_v29 = vpack.c.bf16 %v1573_v31, %v1572_v27 }
 0x1b7   : > { %4465 = vmatmul.msk.bf16.gmra.mxu0 %vm1627_vm3, %v1600_v47  ;;  %v5800_v62 = vpop.permute.xlu2 %4826 }
 0x1b9   : > { %v5776_v28 = vpop.permute.xlu0 %4786 }
 0x1ba   : > { %v4789_v45 = vunpack.i.h.bf16 %v5776_v28 }
 0x1bd   : > { %v4762_v6 = vpop.permute.xlu1 %4761 }
 0x1be   : > { %v4764_v55 = vunpack.i.h.bf16 %v4762_v6  ;;  %v4763_v5 = vunpack.i.l.bf16 %v4762_v6 }
 0x1bf   : > { %v4842_v39 = vpop.permute.xlu2 %4841 }
 0x1c0   : > { %v1570_v57 = vsel %vm442_vm0, %v1538_v30, %v4763_v5  ;;  %v1571_v43 = vsel %vm442_vm0, %v1539_v20, %v4764_v55  ;;  %v4844_v24 = vunpack.i.h.bf16 %v4842_v39  ;;  %v4843_v50 = vunpack.i.l.bf16 %v4842_v39 }
 0x1c1   : > { %v1602_v42 = vpack.c.bf16 %v1571_v43, %v1570_v57 }
 0x1c5   : > { %v4777_v51 = vpop.permute.xlu1 %4776 }
 0x1c6   : > { %v4779_v6 = vunpack.i.h.bf16 %v4777_v51  ;;  %v4778_v13 = vunpack.i.l.bf16 %v4777_v51 }
 0x1c7   : > { %4466 = vmatmul.msk.bf16.gmra.mxu0 %vm1627_vm3, %v1601_v23 }
 0x1c8   : > { %v1543_v25 = vsel %vm1531_vm2, %v5319_v14, %v4779_v6  ;;  %v1542_v51 = vsel %vm1531_vm2, %v5325_v15, %v4778_v13 }
 0x1c9   : > { %v1574_v33 = vsel %vm442_vm0, %v1542_v51, %v4783_v17 }
 0x1cd   : > { %v5781_v2 = vpop.permute.xlu1 %4791  ;;  %v5783_v56 = vpop.permute.xlu0 %4801 }
 0x1ce   : > { %v4794_v59 = vunpack.i.h.bf16 %v5781_v2  ;;  %v4793_v22 = vunpack.i.l.bf16 %v5781_v2  ;;  %v4803_v31 = vunpack.i.l.bf16 %v5783_v56 }
 0x1d5   : > { %v5791_v38 = vpop.permute.xlu1 %4806  ;;  %v5794_v58 = vpop.permute.xlu0 %4816 }
 0x1d6   : > { %v4808_v17 = vunpack.i.l.bf16 %v5791_v38 }
 0x1d7   : > { %4467 = vmatmul.msk.bf16.gmra.mxu0 %vm1627_vm3, %v1602_v42  ;;  %v4788_v42 = vunpack.i.l.bf16 %v5776_v28 }
 0x1dd   : > { %v4822_v10 = vpop.permute.xlu1 %4821  ;;  %v4832_v7 = vpop.permute.xlu0 %4831 }
 0x1de   : > { %v4824_v12 = vunpack.i.h.bf16 %v4822_v10  ;;  %v4823_v34 = vunpack.i.l.bf16 %v4822_v10  ;;  %v4834_v47 = vunpack.i.h.bf16 %v4832_v7  ;;  %v4833_v49 = vunpack.i.l.bf16 %v4832_v7  ;;  %v5842_v10 = vpop.permute.xlu2 %4856 }
 0x1e0   : > { %v1587_v63 = vsel %vm442_vm0, %v1555_v40, %v4824_v12  ;;  %v1586_v8 = vsel %vm442_vm0, %v1554_v61, %v4823_v34  ;;  %v1557_v32 = vsel %vm1531_vm2, %v5462_v46, %v4834_v47  ;;  %v1556_v36 = vsel %vm1531_vm2, %v5471_v48, %v4833_v49  ;;  %v6713_v49 = vld [vmem:[#allocation6_spill] sm:$0xff] }
 0x1e1   : > { %v1610_v21 = vpack.c.bf16 %v1587_v63, %v1586_v8  ;;  %v1588_v35 = vsel %vm442_vm0, %v1556_v36, %v4843_v50  ;;  %v1589_v23 = vsel %vm442_vm0, %v1557_v32, %v4844_v24  ;;  %v1575_v48 = vsel %vm442_vm0, %v1543_v25, %v4784_v4  ;;  %v6715_v25 = vld [vmem:[#allocation14_spill] sm:$0xff] }
 0x1e2   : > { %v1611_v46 = vpack.c.bf16 %v1589_v23, %v1588_v35  ;;  %v1604_v5 = vpack.c.bf16 %v1575_v48, %v1574_v33  ;;  %v4809_v4 = vunpack.i.h.bf16 %v5791_v38  ;;  %v6714_v35 = vld [vmem:[#allocation13_spill] sm:$0xff]  ;;  %v4818_v33 = vunpack.i.l.bf16 %v5794_v58 }
 0x1e3   : > { %4475 = vmatmul.msk.bf16.vlgmr.msra.gmra.mxu2 %vm1627_vm3, %v1610_v21  ;;  %v4804_v21 = vunpack.i.h.bf16 %v5783_v56 }
 0x1e5   : > { %v5812_v11 = vpop.permute.xlu1 %4836  ;;  %v5818_v1 = vpop.permute.xlu0 %4846 }
 0x1e6   : > { %v4872_v61 = vpop.permute.xlu2 %4871 }
 0x1e7   : > { %4468 = vmatmul.msk.bf16.gmra.mxu0 %vm1627_vm3, %v1603_v29  ;;  %v4874_v63 = vunpack.i.h.bf16 %v4872_v61  ;;  %v4873_v8 = vunpack.i.l.bf16 %v4872_v61  ;;  %v6712_v29 = vld [vmem:[#allocation5_spill] sm:$0xff] }
 0x1e8   : > { %v1547_v47 = vsel %vm1531_vm2, %v6712_v29, %v4799_v0  ;;  %v6721_v29 = vld [vmem:[#allocation12_spill] sm:$0xff] }
 0x1ed   : > { %v4852_v55 = vpop.permute.xlu1 %4851  ;;  %v4862_v30 = vpop.permute.xlu0 %4861 }
 0x1ee   : > { %v4854_v19 = vunpack.i.h.bf16 %v4852_v55  ;;  %v4853_v20 = vunpack.i.l.bf16 %v4852_v55  ;;  %v4864_v57 = vunpack.i.h.bf16 %v4862_v30  ;;  %v4863_v43 = vunpack.i.l.bf16 %v4862_v30 }
 0x1f0   : > { %v1559_v14 = vsel %vm1531_vm2, %v5424_v37, %v4854_v19  ;;  %v1558_v15 = vsel %vm1531_vm2, %v5439_v41, %v4853_v20  ;;  %v1545_v37 = vsel %vm1531_vm2, %v5328_v16, %v4789_v45  ;;  %v1544_v41 = vsel %vm1531_vm2, %v5336_v18, %v4788_v42  ;;  %v6717_v20 = vld [vmem:[#allocation8_spill] sm:$0xff] }
 0x1f1   : > { %v1590_v26 = vsel %vm442_vm0, %v1558_v15, %v4863_v43  ;;  %v1591_v60 = vsel %vm442_vm0, %v1559_v14, %v4864_v57  ;;  %v1576_v9 = vsel %vm442_vm0, %v1544_v41, %v4793_v22  ;;  %v1577_v28 = vsel %vm442_vm0, %v1545_v37, %v4794_v59  ;;  %v1615_v14 = vld [vmem:[%s6687_s5 + $0x10] sm:$0x1] }
 0x1f2   : > { %v1612_v44 = vpack.c.bf16 %v1591_v60, %v1590_v26  ;;  %v1605_v12 = vpack.c.bf16 %v1577_v28, %v1576_v9  ;;  %v1548_v38 = vsel %vm1531_vm2, %v6717_v20, %v4808_v17  ;;  %v1616_v45 = vunpack.c.l.bf16 %v1615_v14  ;;  %v6718_v28 = vld [vmem:[#allocation9_spill] sm:$0xff]  ;;  %v2299_v20 = vld [vmem:[%s5951_s23 + $0x10] sm:$0xff] }
 0x1f3   : > { %4476 = vmatmul.msk.bf16.gmra.mxu2 %vm1627_vm3, %v1611_v46  ;;  %v4819_v46 = vunpack.i.h.bf16 %v5794_v58  ;;  %v1580_v43 = vsel %vm442_vm0, %v1548_v38, %v4818_v33  ;;  %v4829_v22 = vunpack.i.h.bf16 %v5800_v62  ;;  %v4828_v26 = vunpack.i.l.bf16 %v5800_v62  ;;  %v1807_v33 = vld [vmem:[%s5923_s19 + $0x30] sm:$0xff]  ;;  %v2300_v38 = vld [vmem:[%s5951_s23 + $0x18] sm:$0xff] }
 0x1f4   : > { %v5891_v42 = vperm.slane %v1616_v45, 0  ;;  %v4839_v41 = vunpack.i.h.bf16 %v5812_v11 }
 0x1f5   : > { %v4867_v2 = vpop.permute.xlu1 %4866  ;;  %v4877_v50 = vpop.permute.xlu0 %4876 }
 0x1f6   : > { %v4869_v34 = vunpack.i.h.bf16 %v4867_v2  ;;  %v4868_v40 = vunpack.i.l.bf16 %v4867_v2  ;;  %v4879_v6 = vunpack.i.h.bf16 %v4877_v50  ;;  %v4878_v13 = vunpack.i.l.bf16 %v4877_v50 }
 0x1f7   : > { %4469 = vmatmul.msk.bf16.gmra.mxu0 %vm1627_vm3, %v1604_v5  ;;  %v6716_v5 = vld [vmem:[#allocation7_spill] sm:$0xff]  ;;  %v1551_v2 = vsel %vm1531_vm2, %v6718_v28, %v4829_v22  ;;  %v2297_v22 = vld [vmem:[%s5951_s23] sm:$0xff] }
 0x1f8   : > { %v1561_v16 = vsel %vm1531_vm2, %v5492_v52, %v4869_v34  ;;  %v1560_v18 = vsel %vm1531_vm2, %v5500_v54, %v4868_v40  ;;  %v1546_v52 = vsel %vm1531_vm2, %v6713_v49, %v4798_v3  ;;  %v1579_v54 = vsel %vm442_vm0, %v1547_v47, %v4804_v21 }
 0x1f9   : > { %v1592_v27 = vsel %vm442_vm0, %v1560_v18, %v4873_v8  ;;  %v1593_v7 = vsel %vm442_vm0, %v1561_v16, %v4874_v63  ;;  %v1578_v24 = vsel %vm442_vm0, %v1546_v52, %v4803_v31  ;;  %v1563_v23 = vsel %vm1531_vm2, %v6714_v35, %v4879_v6 }
 0x1fa   : > { %v1613_v39 = vpack.c.bf16 %v1593_v7, %v1592_v27  ;;  %v1606_v53 = vpack.c.bf16 %v1579_v54, %v1578_v24  ;;  %v1562_v51 = vsel %vm1531_vm2, %v6715_v25, %v4878_v13  ;;  %v1549_v19 = vsel %vm1531_vm2, %v6716_v5, %v4809_v4  ;;  %v6720_v27 = vld [vmem:[#allocation11_spill] sm:$0xff]  ;;  %v1802_v4 = vld [vmem:[%s5923_s19 + $0x8] sm:$0xff]  ;;  %v1805_v25 = vld [vmem:[%s5923_s19 + $0x20] sm:$0xff] }
 0x1fb   : > { %v1581_v57 = vsel %vm442_vm0, %v1549_v19, %v4819_v46  ;;  %v1583_v61 = vsel %vm442_vm0, %v1551_v2, %v4839_v41  ;;  %v4848_v16 = vunpack.i.l.bf16 %v5818_v1  ;;  %v4859_v21 = vunpack.i.h.bf16 %v5842_v10  ;;  %v1806_v5 = vld [vmem:[%s5923_s19 + $0x28] sm:$0xff] }
 0x1fc   : > { %v1607_v15 = vpack.c.bf16 %v1581_v57, %v1580_v43  ;;  %v4858_v31 = vunpack.i.l.bf16 %v5842_v10 }
 0x1fd   : > { %v4882_v56 = vpop.permute.xlu1 %4881  ;;  %v1552_v47 = vsel %vm1531_vm2, %v6721_v29, %v4848_v16  ;;  %v1813_v29 = vld [vmem:[%s5923_s19 + $0x60] sm:$0xff] }
 0x1fe   : > { %v4884_v32 = vunpack.i.h.bf16 %v4882_v56  ;;  %v4883_v36 = vunpack.i.l.bf16 %v4882_v56  ;;  %v1803_v56 = vld [vmem:[%s5923_s19 + $0x10] sm:$0xff] }
 0x200   : > { %v1594_v48 = vsel %vm442_vm0, %v1562_v51, %v4883_v36  ;;  %v1595_v55 = vsel %vm442_vm0, %v1563_v23, %v4884_v32  ;;  %v1801_v32 = vld [vmem:[%s5923_s19] sm:$0xff] }
 0x201   : > { %v1614_v30 = vpack.c.bf16 %v1595_v55, %v1594_v48  ;;  %v1804_v55 = vld [vmem:[%s5923_s19 + $0x18] sm:$0xff] }
 0x203   : > { %4477 = vmatmul.msk.bf16.gmra.mxu2 %vm1627_vm3, %v1612_v44  ;;  %v4838_v44 = vunpack.i.l.bf16 %v5812_v11  ;;  %v4849_v11 = vunpack.i.h.bf16 %v5818_v1 }
 0x205   : > { %v1553_v7 = vsel %vm1531_vm2, %v6720_v27, %v4849_v11  ;;  %v1812_v27 = vld [vmem:[%s5923_s19 + $0x58] sm:$0xff] }
 0x206   : > { %v1585_v1 = vsel %vm442_vm0, %v1553_v7, %v4859_v21 }
 0x207   : > { %4470 = vmatmul.msk.bf16.gmra.mxu0 %vm1627_vm3, %v1605_v12  ;;  %v6719_v12 = vld [vmem:[#allocation10_spill] sm:$0xff] }
 0x208   : > { %v1550_v34 = vsel %vm1531_vm2, %v6719_v12, %v4828_v26  ;;  %v2298_v26 = vld [vmem:[%s5951_s23 + $0x8] sm:$0xff] }
 0x209   : > { %v1582_v62 = vsel %vm442_vm0, %v1550_v34, %v4838_v44  ;;  %v2301_v44 = vld [vmem:[%s5951_s23 + $0x20] sm:$0xff]  ;;  %v1810_v12 = vld [vmem:[%s5923_s19 + $0x48] sm:$0xff] }
 0x20a   : > { %v1608_v8 = vpack.c.bf16 %v1583_v61, %v1582_v62 }
 0x213   : > { %4478 = vmatmul.msk.bf16.gmra.mxu2 %vm1627_vm3, %v1613_v39  ;;  %v1584_v39 = vsel %vm442_vm0, %v1552_v47, %v4858_v31 }
 0x214   : > { %v1609_v24 = vpack.c.bf16 %v1585_v1, %v1584_v39  ;;  %v1814_v1 = vld [vmem:[%s5923_s19 + $0x68] sm:$0xff] }
 0x217   : > { %4471 = vmatmul.msk.bf16.gmra.mxu0 %vm1627_vm3, %v1606_v53 }
 0x223   : > { %4479 = vmatmul.msk.bf16.gmra.mxu2 %vm1627_vm3, %v1614_v30  ;;  %v4890_v30 = vpack.i.bf16 %v2300_v38, %v2299_v20 }
 0x224   : > { %v1689_v58 = vpop.f32.mrf.mxu0 }
 0x225   : > { %v1690_v60 = vadd.f32 %v1689_v58, %v5891_v42  ;;  %4891 = vrot.lane.b32.xlu0 %v4890_v30, %s5151_s29  ;;  %v1817_v30 = vld [vmem:[%s5923_s19 + $0x80] sm:$0xff] }
 0x227   : > { %4472 = vmatmul.msk.bf16.gmra.mxu0 %vm1627_vm3, %v1607_v15  ;;  %v1769_v40 = vmax.f32 %v1690_v60, 0.0  ;;  %v4885_v60 = vpack.i.bf16 %v2298_v26, %v2297_v22  ;;  %v2307_v22 = vld [vmem:[%s5951_s23 + $0x50] sm:$0xff]  ;;  %v2308_v26 = vld [vmem:[%s5951_s23 + $0x58] sm:$0xff] }
 0x229   : > { %4886 = vrot.lane.b32.xlu2 %v4885_v60, %s5151_s29 }
 0x22c   : > { %v1691_v59 = vpop.f32.mrf.mxu0 }
 0x22d   : > { %v1692_v37 = vadd.f32 %v1691_v59, %v5891_v42  ;;  %v1809_v59 = vld [vmem:[%s5923_s19 + $0x40] sm:$0xff] }
 0x22f   : > { %v1770_v9 = vmax.f32 %v1692_v37, 0.0 }
 0x231   : > { %1853 = vmatpush.msra.mxu1 %v1770_v9  ;;  %v2302_v9 = vld [vmem:[%s5951_s23 + $0x28] sm:$0xff] }
 0x232   : > { %v4895_v28 = vpack.i.bf16 %v2302_v9, %v2301_v44  ;;  %v4910_v44 = vpack.i.bf16 %v2308_v26, %v2307_v22 }
 0x233   : > { %1854 = vmatpush.msra.mxu1 %v1769_v40 }
 0x234   : > { %v1694_v63 = vpop.f32.mrf.mxu0  ;;  %4480 = vmatmul.msk.f32.vlgmr.msra.gmra.mxu1 %vm442_vm0, %v1801_v32  ;;  %4896 = vrot.lane.b32.xlu1 %v4895_v28, %s5151_s29 }
 0x235   : > { %v1695_v0 = vadd.f32 %v1694_v63, %v5891_v42  ;;  %v1811_v63 = vld [vmem:[%s5923_s19 + $0x50] sm:$0xff] }
 0x237   : > { %4473 = vmatmul.msk.bf16.gmra.mxu0 %vm1627_vm3, %v1608_v8  ;;  %v1771_v52 = vmax.f32 %v1695_v0, 0.0  ;;  %v1808_v8 = vld [vmem:[%s5923_s19 + $0x38] sm:$0xff] }
 0x23c   : > { %v1696_v18 = vpop.f32.mrf.mxu0  ;;  %4481 = vmatmul.msk.f32.gmra.mxu1 %vm442_vm0, %v1802_v4  ;;  %v2305_v4 = vld [vmem:[%s5951_s23 + $0x40] sm:$0xff]  ;;  %4911 = vrot.lane.b32.xlu1 %v4910_v44, %s5151_s29 }
 0x23d   : > { %v1697_v3 = vadd.f32 %v1696_v18, %v5891_v42 }
 0x23f   : > { %v1772_v49 = vmax.f32 %v1697_v3, 0.0 }
 0x241   : > { %1882 = vmatpush.msrb.mxu2 %v1772_v49 }
 0x243   : > { %1883 = vmatpush.msrb.mxu2 %v1771_v52 }
 0x244   : > { %v1699_v54 = vpop.f32.mrf.mxu0  ;;  %4482 = vmatmul.msk.f32.vlgmr.msrb.gmra.mxu2 %vm442_vm0, %v1803_v56 }
 0x245   : > { %v1700_v53 = vadd.f32 %v1699_v54, %v5891_v42 }
 0x247   : > { %4474 = vmatmul.msk.bf16.gmra.mxu0 %vm1627_vm3, %v1609_v24  ;;  %v1773_v13 = vmax.f32 %v1700_v53, 0.0 }
 0x24c   : > { %v1701_v10 = vpop.f32.mrf.mxu0  ;;  %4483 = vmatmul.msk.f32.gmra.mxu2 %vm442_vm0, %v1804_v55 }
 0x24d   : > { %v1702_v50 = vadd.f32 %v1701_v10, %v5891_v42 }
 0x24f   : > { %v1774_v6 = vmax.f32 %v1702_v50, 0.0  ;;  %v1815_v50 = vld [vmem:[%s5923_s19 + $0x70] sm:$0xff] }
 0x251   : > { %1911 = vmatpush.msrb.mxu3 %v1774_v6  ;;  %v2303_v6 = vld [vmem:[%s5951_s23 + $0x30] sm:$0xff] }
 0x253   : > { %1912 = vmatpush.msrb.mxu3 %v1773_v13  ;;  %v2304_v13 = vld [vmem:[%s5951_s23 + $0x38] sm:$0xff] }
 0x254   : > { %v1704_v36 = vpop.f32.mrf.mxu0  ;;  %4484 = vmatmul.msk.f32.vlgmr.msrb.gmra.mxu3 %vm442_vm0, %v1805_v25  ;;  %v4900_v32 = vpack.i.bf16 %v2304_v13, %v2303_v6  ;;  %v1826_v6 = vld [vmem:[%s5923_s19 + $0xc8] sm:$0xff]  ;;  %v1829_v13 = vld [vmem:[%s5923_s19 + $0xe0] sm:$0xff] }
 0x255   : > { %v1705_v35 = vadd.f32 %v1704_v36, %v5891_v42 }
 0x256   : > { %4901 = vrot.lane.b32.xlu2 %v4900_v32, %s5151_s29  ;;  %v4657_v32 = vld [vmem:[%s6687_s5 + $0x18] sm:$0xff] }
 0x257   : > { %v1775_v46 = vmax.f32 %v1705_v35, 0.0 }
 0x25c   : > { %v1706_v17 = vpop.f32.mrf.mxu0  ;;  %4485 = vmatmul.msk.f32.gmra.mxu3 %vm442_vm0, %v1806_v5 }
 0x25d   : > { %v1707_v23 = vadd.f32 %v1706_v17, %v5891_v42  ;;  %v2306_v17 = vld [vmem:[%s5951_s23 + $0x48] sm:$0xff] }
 0x25e   : > { %v4905_v25 = vpack.i.bf16 %v2306_v17, %v2305_v4  ;;  %v1831_v4 = vld [vmem:[%s5923_s19 + $0xf0] sm:$0xff]  ;;  %v2309_v17 = vld [vmem:[%s5951_s23 + $0x60] sm:$0xff] }
 0x25f   : > { %v1776_v51 = vmax.f32 %v1707_v23, 0.0  ;;  %v1816_v23 = vld [vmem:[%s5923_s19 + $0x78] sm:$0xff] }
 0x260   : > { %4906 = vrot.lane.b32.xlu0 %v4905_v25, %s5151_s29 }
 0x261   : > { %1940 = vmatpush.msrb.mxu1 %v1776_v51 }
 0x263   : > { %1941 = vmatpush.msrb.mxu1 %v1775_v46 }
 0x264   : > { %v1709_v48 = vpop.f32.mrf.mxu0  ;;  %4486 = vmatmul.msk.f32.vlgmr.msrb.gmra.mxu1 %vm442_vm0, %v1807_v33 }
 0x265   : > { %v1710_v43 = vadd.f32 %v1709_v48, %v5891_v42 }
 0x266   : > { %v5942_v19 = vpop.f32.mrf.mxu2 }
 0x267   : > { %v1777_v45 = vmax.f32 %v1710_v43, 0.0  ;;  %v1745_v55 = vadd.f32 %v5942_v19, %v5891_v42 }
 0x269   : > { %v1791_v43 = vmax.f32 %v1745_v55, 0.0  ;;  %v2311_v55 = vld [vmem:[%s5951_s23 + $0x70] sm:$0xff] }
 0x26c   : > { %v1711_v57 = vpop.f32.mrf.mxu0  ;;  %4487 = vmatmul.msk.f32.gmra.mxu1 %vm442_vm0, %v1808_v8 }
 0x26d   : > { %v1712_v14 = vadd.f32 %v1711_v57, %v5891_v42 }
 0x26e   : > { %v5958_v15 = vpop.f32.mrf.mxu2 }
 0x26f   : > { %v1778_v58 = vmax.f32 %v1712_v14, 0.0  ;;  %v1747_v33 = vadd.f32 %v5958_v15, %v5891_v42 }
 0x271   : > { %1969 = vmatpush.msra.mxu2 %v1778_v58  ;;  %v1792_v38 = vmax.f32 %v1747_v33, 0.0 }
 0x273   : > { %1970 = vmatpush.msra.mxu2 %v1777_v45  ;;  %v1818_v45 = vld [vmem:[%s5923_s19 + $0x88] sm:$0xff] }
 0x274   : > { %v1714_v37 = vpop.f32.mrf.mxu0  ;;  %4488 = vmatmul.msk.f32.vlgmr.msra.gmra.mxu2 %vm442_vm0, %v1809_v59 }
 0x275   : > { %v1715_v34 = vadd.f32 %v1714_v37, %v5891_v42 }
 0x276   : > { %v5965_v41 = vpop.f32.mrf.mxu2 }
 0x277   : > { %v1779_v62 = vmax.f32 %v1715_v34, 0.0 }
 0x27c   : > { %v1716_v2 = vpop.f32.mrf.mxu0  ;;  %4489 = vmatmul.msk.f32.gmra.mxu2 %vm442_vm0, %v1810_v12  ;;  %v1750_v12 = vadd.f32 %v5965_v41, %v5891_v42 }
 0x27d   : > { %v1717_v40 = vadd.f32 %v1716_v2, %v5891_v42 }
 0x27e   : > { %v5977_v11 = vpop.f32.mrf.mxu2 }
 0x27f   : > { %v1780_v61 = vmax.f32 %v1717_v40, 0.0  ;;  %v1752_v9 = vadd.f32 %v5977_v11, %v5891_v42  ;;  %v1819_v40 = vld [vmem:[%s5923_s19 + $0x90] sm:$0xff]  ;;  %v1793_v11 = vmax.f32 %v1750_v12, 0.0 }
 0x281   : > { %1998 = vmatpush.msra.mxu3 %v1780_v61 }
 0x283   : > { %1999 = vmatpush.msra.mxu3 %v1779_v62  ;;  %v1823_v62 = vld [vmem:[%s5923_s19 + $0xb0] sm:$0xff]  ;;  %v4887_v25 = vpop.permute.xlu2 %4886 }
 0x284   : > { %v1719_v16 = vpop.f32.mrf.mxu0  ;;  %4490 = vmatmul.msk.f32.vlgmr.msra.gmra.mxu3 %vm442_vm0, %v1811_v63  ;;  %v1794_v63 = vmax.f32 %v1752_v9, 0.0  ;;  %v4889_v33 = vunpack.i.h.bf16 %v4887_v25 }
 0x285   : > { %v1720_v0 = vadd.f32 %v1719_v16, %v5891_v42 }
 0x286   : > { %v5981_v3 = vpop.f32.mrf.mxu2 }
 0x287   : > { %v1781_v7 = vmax.f32 %v1720_v0, 0.0  ;;  %v1820_v0 = vld [vmem:[%s5923_s19 + $0x98] sm:$0xff] }
 0x28c   : > { %v1721_v18 = vpop.f32.mrf.mxu0  ;;  %4491 = vmatmul.msk.f32.gmra.mxu3 %vm442_vm0, %v1812_v27 }
 0x28d   : > { %v1722_v21 = vadd.f32 %v1721_v18, %v5891_v42 }
 0x28e   : > { %v5988_v49 = vpop.f32.mrf.mxu2 }
 0x28f   : > { %v1782_v31 = vmax.f32 %v1722_v21, 0.0  ;;  %v2398_v21 = vld [vmem:[%s6687_s5 + $0x28] sm:$0xf] }
 0x291   : > { %2027 = vmatpush.msra.mxu1 %v1782_v31 }
 0x293   : > { %2028 = vmatpush.msra.mxu1 %v1781_v7 }
 0x294   : > { %v1724_v47 = vpop.f32.mrf.mxu0  ;;  %4492 = vmatmul.msk.f32.vlgmr.msra.gmra.mxu1 %vm442_vm0, %v1813_v29  ;;  %v2419_v29 = vunpack.c.l.b16 %v2398_v21 }
 0x295   : > { %v1725_v39 = vadd.f32 %v1724_v47, %v5891_v42  ;;  %v1757_v47 = vadd.f32 %v5988_v49, %v5891_v42 }
 0x296   : > { %v1759_v53 = vpop.f32.mrf.mxu2 }
 0x297   : > { %v1783_v10 = vmax.f32 %v1725_v39, 0.0  ;;  %v1760_v57 = vadd.f32 %v1759_v53, %v5891_v42  ;;  %v1796_v53 = vmax.f32 %v1757_v47, 0.0 }
 0x299   : > { %v1797_v19 = vmax.f32 %v1760_v57, 0.0 }
 0x29c   : > { %v1726_v52 = vpop.f32.mrf.mxu0  ;;  %4493 = vmatmul.msk.f32.gmra.mxu1 %vm442_vm0, %v1814_v1  ;;  %v1755_v1 = vadd.f32 %v5981_v3, %v5891_v42  ;;  %v1822_v3 = vld [vmem:[%s5923_s19 + $0xa8] sm:$0xff] }
 0x29d   : > { %v1727_v54 = vadd.f32 %v1726_v52, %v5891_v42 }
 0x29e   : > { %v1761_v36 = vpop.f32.mrf.mxu2  ;;  %v1795_v49 = vmax.f32 %v1755_v1, 0.0 }
 0x29f   : > { %v1784_v24 = vmax.f32 %v1727_v54, 0.0  ;;  %v1762_v5 = vadd.f32 %v1761_v36, %v5891_v42  ;;  %v1821_v54 = vld [vmem:[%s5923_s19 + $0xa0] sm:$0xff]  ;;  %v1827_v36 = vld [vmem:[%s5923_s19 + $0xd0] sm:$0xff] }
 0x2a1   : > { %2056 = vmatpush.msrb.mxu2 %v1784_v24  ;;  %v1798_v58 = vmax.f32 %v1762_v5, 0.0  ;;  %v2422_v24 = vpack.c.b16 %v2419_v29, %v2419_v29  ;;  %v2312_v5 = vld [vmem:[%s5951_s23 + $0x78] sm:$0xff] }
 0x2a3   : > { %2057 = vmatpush.msrb.mxu2 %v1783_v10  ;;  %v1825_v10 = vld [vmem:[%s5923_s19 + $0xc0] sm:$0xff] }
 0x2a4   : > { %v1729_v56 = vpop.f32.mrf.mxu0  ;;  %4494 = vmatmul.msk.f32.vlgmr.msrb.gmra.mxu2 %vm442_vm0, %v1815_v50  ;;  %v1824_v50 = vld [vmem:[%s5923_s19 + $0xb8] sm:$0xff] }
 0x2a5   : > { %v1730_v51 = vadd.f32 %v1729_v56, %v5891_v42  ;;  %v4658_v56 = vld [vmem:[%s6687_s5 + $0x20] sm:$0xff] }
 0x2a6   : > { %v1764_v15 = vpop.f32.mrf.mxu2  ;;  %v4897_v9 = vpop.permute.xlu1 %4896 }
 0x2a7   : > { %v1785_v20 = vmax.f32 %v1730_v51, 0.0  ;;  %v1765_v8 = vadd.f32 %v1764_v15, %v5891_v42 }
 0x2a9   : > { %v1799_v41 = vmax.f32 %v1765_v8, 0.0 }
 0x2ac   : > { %v1731_v35 = vpop.f32.mrf.mxu0  ;;  %4495 = vmatmul.msk.f32.gmra.mxu2 %vm442_vm0, %v1816_v23 }
 0x2ad   : > { %v1732_v46 = vadd.f32 %v1731_v35, %v5891_v42  ;;  %v2310_v35 = vld [vmem:[%s5951_s23 + $0x68] sm:$0xff] }
 0x2ae   : > { %v1766_v28 = vpop.f32.mrf.mxu2  ;;  %v4915_v23 = vpack.i.bf16 %v2310_v35, %v2309_v17 }
 0x2af   : > { %v1786_v48 = vmax.f32 %v1732_v46, 0.0  ;;  %v1767_v61 = vadd.f32 %v1766_v28, %v5891_v42  ;;  %v1828_v46 = vld [vmem:[%s5923_s19 + $0xd8] sm:$0xff]  ;;  %v4899_v28 = vunpack.i.h.bf16 %v4897_v9 }
 0x2b0   : > { %4916 = vrot.lane.b32.xlu2 %v4915_v23, %s5151_s29 }
 0x2b1   : > { %2085 = vmatpush.msrb.mxu3 %v1786_v48  ;;  %v1800_v18 = vmax.f32 %v1767_v61, 0.0  ;;  %v1856_v51 = vpop.f32.mrf.mxu1  ;;  %v4888_v48 = vunpack.i.l.bf16 %v4887_v25 }
 0x2b3   : > { %2086 = vmatpush.msrb.mxu3 %v1785_v20 }
 0x2b4   : > { %v1734_v14 = vpop.f32.mrf.mxu0  ;;  %4496 = vmatmul.msk.f32.vlgmr.msrb.gmra.mxu3 %vm442_vm0, %v1817_v30  ;;  %v2378_v30 = vsel %vm2377_vm4, %v1856_v51, %v4888_v48 }
 0x2b5   : > { %2172 = vmatpush.msra.mxu3 %v1792_v38  ;;  %v1735_v60 = vadd.f32 %v1734_v14, %v5891_v42  ;;  %v4920_v38 = vpack.i.bf16 %v2312_v5, %v2311_v55 }
 0x2b7   : > { %2173 = vmatpush.msra.mxu3 %v1791_v43  ;;  %v1787_v34 = vmax.f32 %v1735_v60, 0.0  ;;  %4921 = vrot.lane.b32.xlu0 %v4920_v38, %s5151_s29 }
 0x2b9   : > { %2259 = vmatpush.msrb.mxu3 %v1798_v58  ;;  %v6075_v14 = vpop.f32.mrf.mxu1  ;;  %v4892_v58 = vpop.permute.xlu0 %4891 }
 0x2bb   : > { %2260 = vmatpush.msrb.mxu3 %v1797_v19  ;;  %v4894_v19 = vunpack.i.h.bf16 %v4892_v58 }
 0x2bc   : > { %v1736_v59 = vpop.f32.mrf.mxu0  ;;  %4497 = vmatmul.msk.f32.gmra.mxu3 %vm442_vm0, %v1818_v45  ;;  %v4893_v45 = vunpack.i.l.bf16 %v4892_v58 }
 0x2bd   : > { %v1737_v37 = vadd.f32 %v1736_v59, %v5891_v42 }
 0x2bf   : > { %v1788_v2 = vmax.f32 %v1737_v37, 0.0 }
 0x2c1   : > { %2114 = vmatpush.msrb.mxu1 %v1788_v2  ;;  %v4898_v2 = vunpack.i.l.bf16 %v4897_v9 }
 0x2c3   : > { %2115 = vmatpush.msrb.mxu1 %v1787_v34 }
 0x2c4   : > { %v1739_v16 = vpop.f32.mrf.mxu0  ;;  %4498 = vmatmul.msk.f32.vlgmr.msrb.gmra.mxu1 %vm442_vm0, %v1819_v40  ;;  %4502 = vmatmul.msk.f32.vlgmr.msra.gmra.mxu3 %vm442_vm0, %v1823_v62 }
 0x2c5   : > { %2201 = vmatpush.msra.mxu1 %v1794_v63  ;;  %v1740_v27 = vadd.f32 %v1739_v16, %v5891_v42  ;;  %v4902_v16 = vpop.permute.xlu2 %4901 }
 0x2c7   : > { %2202 = vmatpush.msra.mxu1 %v1793_v11  ;;  %v1789_v39 = vmax.f32 %v1740_v27, 0.0  ;;  %v1885_v20 = vpop.f32.mrf.mxu2  ;;  %v4903_v11 = vunpack.i.l.bf16 %v4902_v16 }
 0x2c8   : > { %v2379_v57 = vsel %vm2377_vm4, %v1885_v20, %v4889_v33 }
 0x2c9   : > { %2288 = vmatpush.msrb.mxu1 %v1800_v18  ;;  %v2399_v43 = vpack.c.bf16 %v2379_v57, %v2378_v30 }
 0x2cb   : > { %2289 = vmatpush.msrb.mxu1 %v1799_v41  ;;  %v4904_v41 = vunpack.i.h.bf16 %v4902_v16 }
 0x2cc   : > { %v1741_v31 = vpop.f32.mrf.mxu0  ;;  %4499 = vmatmul.msk.f32.gmra.mxu1 %vm442_vm0, %v1820_v0  ;;  %4503 = vmatmul.msk.f32.gmra.mxu3 %vm442_vm0, %v1824_v50 }
 0x2cd   : > { %v1742_v7 = vadd.f32 %v1741_v31, %v5891_v42  ;;  %v2451_v42 = vsel %vm1676_vm1, %v2422_v24, 0 }
 0x2cf   : > { %v1790_v52 = vmax.f32 %v1742_v7, 0.0  ;;  %v6080_v37 = vpop.f32.mrf.mxu2 }
 0x2d1   : > { %2143 = vmatpush.msra.mxu2 %v1790_v52 }
 0x2d2   : > { %v4907_v47 = vpop.permute.xlu0 %4906 }
 0x2d3   : > { %2144 = vmatpush.msra.mxu2 %v1789_v39  ;;  %v4908_v52 = vunpack.i.l.bf16 %v4907_v47  ;;  %v4909_v39 = vunpack.i.h.bf16 %v4907_v47 }
 0x2d4   : > { %4500 = vmatmul.msk.f32.vlgmr.msra.gmra.mxu2 %vm442_vm0, %v1821_v54  ;;  %4504 = vmatmul.msk.f32.vlgmr.msra.gmra.mxu1 %vm442_vm0, %v1825_v10 }
 0x2d5   : > { %2230 = vmatpush.msrb.mxu2 %v1796_v53  ;;  %4508 = vmatmul.msk.f32.vlgmr.msrb.gmra.mxu3 %vm442_vm0, %v1829_v13 }
 0x2d7   : > { %2231 = vmatpush.msrb.mxu2 %v1795_v49  ;;  %v1914_v15 = vpop.f32.mrf.mxu3 }
 0x2d8   : > { %v2380_v22 = vsel %vm2377_vm4, %v1914_v15, %v4893_v45  ;;  %v2407_v15 = vld [vmem:[%s6687_s5 + $0x30] sm:$0x1] }
 0x2d9   : > { %2458 = vmatpush.bf16.msra.mxu2 %v2451_v42  ;;  %v4912_v42 = vpop.permute.xlu1 %4911 }
 0x2dc   : > { %4501 = vmatmul.msk.f32.gmra.mxu2 %vm442_vm0, %v1822_v3  ;;  %4505 = vmatmul.msk.f32.gmra.mxu1 %vm442_vm0, %v1826_v6  ;;  %v4914_v3 = vunpack.i.h.bf16 %v4912_v42  ;;  %v4913_v6 = vunpack.i.l.bf16 %v4912_v42 }
 0x2dd   : > { %2459 = vmatpush.bf16.msra.mxu2 %v4658_v56 }
 0x2df   : > { %v6082_v44 = vpop.f32.mrf.mxu3 }
 0x2e1   : > { %2460 = vmatpush.bf16.msra.mxu2 %v4657_v32  ;;  %v1943_v59 = vpop.f32.mrf.mxu1 }
 0x2e2   : > { %v2381_v26 = vsel %vm2377_vm4, %v1943_v59, %v4894_v19  ;;  %v2408_v59 = vunpack.c.l.bf16 %v2407_v15 }
 0x2e3   : > { %v2400_v60 = vpack.c.bf16 %v2381_v26, %v2380_v22 }
 0x2e4   : > { %4506 = vmatmul.msk.f32.vlgmr.msrb.gmra.mxu2 %vm442_vm0, %v1827_v36  ;;  %4510 = vmatmul.msk.f32.vlgmr.msrb.gmra.mxu1 %vm442_vm0, %v1831_v4 }
 0x2e9   : > { %v6088_v63 = vpop.f32.mrf.mxu1 }
 0x2ec   : > { %4507 = vmatmul.msk.f32.gmra.mxu2 %vm442_vm0, %v1828_v46 }
 0x2f4   : > { %4520 = vmatmul.msk.bf16.vlgmr.msra.gmra.mxu2 %vm2425_vm5, %v2399_v43 }
 0x2f7   : > { %v1972_v12 = vpop.f32.mrf.mxu2 }
 0x2f8   : > { %v2382_v40 = vsel %vm2377_vm4, %v1972_v12, %v4898_v2 }
 0x2ff   : > { %v6090_v8 = vpop.f32.mrf.mxu2 }
 0x304   : > { %4521 = vmatmul.msk.bf16.gmra.mxu2 %vm2425_vm5, %v2400_v60 }
 0x307   : > { %v2001_v34 = vpop.f32.mrf.mxu3 }
 0x308   : > { %v2383_v61 = vsel %vm2377_vm4, %v2001_v34, %v4899_v28  ;;  %v6127_v28 = vperm.slane %v2408_v59, 0 }
 0x309   : > { %v2401_v62 = vpack.c.bf16 %v2383_v61, %v2382_v40 }
 0x30a   : > { %v4917_v35 = vpop.permute.xlu2 %4916 }
 0x30b   : > { %v4918_v51 = vunpack.i.l.bf16 %v4917_v35  ;;  %v4919_v46 = vunpack.i.h.bf16 %v4917_v35 }
 0x30f   : > { %v6095_v7 = vpop.f32.mrf.mxu3 }
 0x311   : > { %v2030_v18 = vpop.f32.mrf.mxu1 }
 0x312   : > { %v2384_v0 = vsel %vm2377_vm4, %v2030_v18, %v4903_v11 }
 0x314   : > { %4522 = vmatmul.msk.bf16.gmra.mxu2 %vm2425_vm5, %v2401_v62 }
 0x319   : > { %v6097_v29 = vpop.f32.mrf.mxu1 }
 0x327   : > { %v2059_v21 = vpop.f32.mrf.mxu2 }
 0x328   : > { %v2385_v31 = vsel %vm2377_vm4, %v2059_v21, %v4904_v41 }
 0x329   : > { %v2402_v27 = vpack.c.bf16 %v2385_v31, %v2384_v0  ;;  %v4922_v30 = vpop.permute.xlu0 %4921 }
 0x32a   : > { %v4924_v43 = vunpack.i.h.bf16 %v4922_v30  ;;  %v4923_v58 = vunpack.i.l.bf16 %v4922_v30  ;;  %v4659_v30 = vld [vmem:[%s6687_s5 + $0x38] sm:$0xff] }
 0x32b   : > { %4523 = vmatmul.msk.bf16.gmra.mxu2 %vm2425_vm5, %v2402_v27 }
 0x32f   : > { %v6104_v49 = vpop.f32.mrf.mxu2 }
 0x337   : > { %v2088_v1 = vpop.f32.mrf.mxu3 }
 0x338   : > { %v2386_v54 = vsel %vm2377_vm4, %v2088_v1, %v4908_v52 }
 0x33f   : > { %v6102_v50 = vpop.f32.mrf.mxu3 }
 0x341   : > { %v2117_v24 = vpop.f32.mrf.mxu1 }
 0x342   : > { %v2387_v10 = vsel %vm2377_vm4, %v2117_v24, %v4909_v39 }
 0x343   : > { %v2403_v53 = vpack.c.bf16 %v2387_v10, %v2386_v54 }
 0x345   : > { %4524 = vmatmul.msk.bf16.gmra.mxu2 %vm2425_vm5, %v2403_v53 }
 0x347   : > { %v2175_v56 = vpop.f32.mrf.mxu3 }
 0x348   : > { %v2389_v32 = vsel %vm2377_vm4, %v2175_v56, %v4914_v3 }
 0x349   : > { %v6106_v13 = vpop.f32.mrf.mxu1 }
 0x34f   : > { %v6114_v48 = vpop.f32.mrf.mxu3 }
 0x351   : > { %v2204_v25 = vpop.f32.mrf.mxu1 }
 0x352   : > { %v2390_v33 = vsel %vm2377_vm4, %v2204_v25, %v4918_v51  ;;  %v4661_v51 = vld [vmem:[%s6687_s5 + $0x48] sm:$0xff] }
 0x357   : > { %v2146_v36 = vpop.f32.mrf.mxu2 }
 0x358   : > { %v2388_v4 = vsel %vm2377_vm4, %v2146_v36, %v4913_v6  ;;  %v2262_v19 = vpop.f32.mrf.mxu3 }
 0x359   : > { %v2404_v17 = vpack.c.bf16 %v2389_v32, %v2388_v4  ;;  %v6116_v5 = vpop.f32.mrf.mxu1  ;;  %v2392_v22 = vsel %vm2377_vm4, %v2262_v19, %v4923_v58  ;;  %v4662_v4 = vld [vmem:[%s6687_s5 + $0x50] sm:$0xff] }
 0x35a   : > { %2670 = vmatpush.bf16.msra.mxu3 %v4662_v4 }
 0x35b   : > { %4525 = vmatmul.msk.bf16.gmra.mxu2 %vm2425_vm5, %v2404_v17 }
 0x35e   : > { %2671 = vmatpush.bf16.msra.mxu3 %v4661_v51 }
 0x35f   : > { %v6111_v23 = vpop.f32.mrf.mxu2 }
 0x361   : > { %v2291_v45 = vpop.f32.mrf.mxu1 }
 0x362   : > { %v2393_v26 = vsel %vm2377_vm4, %v2291_v45, %v4924_v43  ;;  %v1832_v43 = vld [vmem:[%s5923_s19 + $0xf8] sm:$0xff] }
 0x363   : > { %v2406_v9 = vpack.c.bf16 %v2393_v26, %v2392_v22  ;;  %4511 = vmatmul.msk.f32.gmra.mxu1 %vm442_vm0, %v1832_v43 }
 0x367   : > { %v2233_v55 = vpop.f32.mrf.mxu2 }
 0x368   : > { %v2391_v20 = vsel %vm2377_vm4, %v2233_v55, %v4919_v46  ;;  %v1830_v55 = vld [vmem:[%s5923_s19 + $0xe8] sm:$0xff]  ;;  %s4267_s19 = sshll.u32 %s4264_s18, 4  ;;  %s4268_s19 = int_to_ptr.hbm [resolvable:$true] %s4267_s19 }
 0x369   : > { %v2405_v38 = vpack.c.bf16 %v2391_v20, %v2390_v33  ;;  %4509 = vmatmul.msk.f32.gmra.mxu3 %vm442_vm0, %v1830_v55  ;;  %s5099_s23 = sshra.s32 %s4268_s19, 4  ;;  %s5100_s23 = int_to_ptr.hbm [resolvable:$true] %s5099_s23 }
 0x36a   : > { %s5101_s8 = scalar_lea.hbm %s5100_s23, 128  ;;  %p5106_p0 = scmp.lt.s32.totalorder %s5100_s23, %s6689_s7 }
 0x36b   : > { %4526 = vmatmul.msk.bf16.gmra.mxu2 %vm2425_vm5, %v2405_v38  ;;  %v4660_v38 = vld [vmem:[%s6687_s5 + $0x40] sm:$0xff]  ;;  %p5102_p11 = scmp.ne.s32.totalorder %s5100_s23, %s5101_s8 }
 0x36c   : > { %2672 = vmatpush.bf16.msra.mxu3 %v4660_v38 }
 0x36d   : > { %p5103_p12 = pnand %p5102_p11, %p5233_p5 }
 0x36f   : > { %v6120_v57 = vpop.f32.mrf.mxu2  ;;  %p5104_p13 = pneg %p5103_p12 }
 0x370   : > { %2673 = vmatpush.bf16.msra.mxu3 %v4659_v30 }
 0x377   : > { %v2462_v60 = vpop.f32.mrf.mxu2 }
 0x378   : > { %v2463_v2 = vadd.f32 %v2462_v60, %v6127_v28 }
 0x37a   : > { %v2502_v34 = vmax.f32 %v2463_v2, 0.0 }
 0x37b   : > { %4527 = vmatmul.msk.bf16.gmra.mxu2 %vm2425_vm5, %v2406_v9 }
 0x37f   : > { %v2464_v12 = vpop.f32.mrf.mxu2 }
 0x380   : > { %v2465_v40 = vadd.f32 %v2464_v12, %v6127_v28 }
 0x382   : > { %v2503_v61 = vmax.f32 %v2465_v40, 0.0 }
 0x384   : > { %v4925_v62 = vpack.i.bf16 %v2503_v61, %v2502_v34 }
 0x386   : > { %4926 = vrot.lane.b32.xlu1 %v4925_v62, %s5151_s29 }
 0x387   : > { %v2467_v16 = vpop.f32.mrf.mxu2 }
 0x388   : > { %v2468_v11 = vadd.f32 %v2467_v16, %v6127_v28 }
 0x38a   : > { %v2504_v41 = vmax.f32 %v2468_v11, 0.0 }
 0x38f   : > { %v2469_v18 = vpop.f32.mrf.mxu2 }
 0x390   : > { %v2470_v0 = vadd.f32 %v2469_v18, %v6127_v28 }
 0x392   : > { %v2505_v21 = vmax.f32 %v2470_v0, 0.0 }
 0x394   : > { %v4930_v31 = vpack.i.bf16 %v2505_v21, %v2504_v41 }
 0x396   : > { %4931 = vrot.lane.b32.xlu2 %v4930_v31, %s5151_s29 }
 0x397   : > { %v2472_v27 = vpop.f32.mrf.mxu2 }
 0x398   : > { %v2473_v47 = vadd.f32 %v2472_v27, %v6127_v28 }
 0x39a   : > { %v2506_v1 = vmax.f32 %v2473_v47, 0.0 }
 0x39f   : > { %v2474_v52 = vpop.f32.mrf.mxu2 }
 0x3a0   : > { %v2475_v39 = vadd.f32 %v2474_v52, %v6127_v28 }
 0x3a2   : > { %v2507_v54 = vmax.f32 %v2475_v39, 0.0 }
 0x3a4   : > { %v4935_v24 = vpack.i.bf16 %v2507_v54, %v2506_v1 }
 0x3a6   : > { %4936 = vrot.lane.b32.xlu0 %v4935_v24, %s5151_s29 }
 0x3ae   : > { %v2477_v10 = vpop.f32.mrf.mxu2 }
 0x3af   : > { %v2478_v53 = vadd.f32 %v2477_v10, %v6127_v28 }
 0x3b1   : > { %v2508_v3 = vmax.f32 %v2478_v53, 0.0 }
 0x3b6   : > { %v2479_v42 = vpop.f32.mrf.mxu2 }
 0x3b7   : > { %v2480_v56 = vadd.f32 %v2479_v42, %v6127_v28 }
 0x3b9   : > { %v2509_v6 = vmax.f32 %v2480_v56, 0.0 }
 0x3bb   : > { %v4940_v32 = vpack.i.bf16 %v2509_v6, %v2508_v3 }
 0x3bd   : > { %4941 = vrot.lane.b32.xlu1 %v4940_v32, %s5151_s29 }
 0x3c8   : > { %v2482_v36 = vpop.f32.mrf.mxu2 }
 0x3c9   : > { %v2483_v17 = vadd.f32 %v2482_v36, %v6127_v28 }
 0x3cb   : > { %v2510_v46 = vmax.f32 %v2483_v17, 0.0 }
 0x3d0   : > { %v2484_v35 = vpop.f32.mrf.mxu2 }
 0x3d1   : > { %v2485_v25 = vadd.f32 %v2484_v35, %v6127_v28 }
 0x3d3   : > { %v2511_v33 = vmax.f32 %v2485_v25, 0.0 }
 0x3d5   : > { %v4945_v20 = vpack.i.bf16 %v2511_v33, %v2510_v46 }
 0x3d7   : > { %4946 = vrot.lane.b32.xlu2 %v4945_v20, %s5151_s29 }
 0x3de   : > { %v2487_v58 = vpop.f32.mrf.mxu2 }
 0x3df   : > { %v2488_v15 = vadd.f32 %v2487_v58, %v6127_v28 }
 0x3e1   : > { %v2512_v59 = vmax.f32 %v2488_v15, 0.0 }
 0x3e6   : > { %v2489_v19 = vpop.f32.mrf.mxu2 }
 0x3e7   : > { %v2490_v45 = vadd.f32 %v2489_v19, %v6127_v28 }
 0x3e9   : > { %v2513_v22 = vmax.f32 %v2490_v45, 0.0 }
 0x3eb   : > { %v4950_v26 = vpack.i.bf16 %v2513_v22, %v2512_v59 }
 0x3ed   : > { %4951 = vrot.lane.b32.xlu0 %v4950_v26, %s5151_s29 }
 0x3ee   : > { %v2492_v60 = vpop.f32.mrf.mxu2 }
 0x3ef   : > { %v2493_v9 = vadd.f32 %v2492_v60, %v6127_v28  ;;  %v2294_v60 = vpop.f32.mrf.mxu1 }
 0x3f0   : > { %v4932_v31 = vpop.permute.xlu2 %4931 }
 0x3f1   : > { %v2514_v40 = vmax.f32 %v2493_v9, 0.0  ;;  %v4934_v47 = vunpack.i.h.bf16 %v4932_v31  ;;  %v4933_v52 = vunpack.i.l.bf16 %v4932_v31  ;;  %v6247_v31 = vld [vmem:[%s6217_s9 + $0x10] sm:$0xff] }
 0x3f6   : > { %v2494_v2 = vpop.f32.mrf.mxu2 }
 0x3f7   : > { %v2495_v12 = vadd.f32 %v2494_v2, %v6127_v28 }
 0x3f8   : > { %v4927_v34 = vpop.permute.xlu1 %4926 }
 0x3f9   : > { %v2515_v61 = vmax.f32 %v2495_v12, 0.0  ;;  %v4929_v62 = vunpack.i.h.bf16 %v4927_v34  ;;  %v4928_v16 = vunpack.i.l.bf16 %v4927_v34 }
 0x3fb   : > { %v4955_v11 = vpack.i.bf16 %v2515_v61, %v2514_v40  ;;  %v2583_v18 = vsel %vm2377_vm4, %v6080_v37, %v4929_v62  ;;  %v2582_v41 = vsel %vm2377_vm4, %v6075_v14, %v4928_v16  ;;  %v2584_v37 = vsel %vm2377_vm4, %v6082_v44, %v4933_v52  ;;  %v6224_v61 = vld [vmem:[%s6217_s9] sm:$0xff] }
 0x3fc   : > { %v2606_v0 = vpack.c.bf16 %v2583_v18, %v2582_v41  ;;  %v2585_v14 = vsel %vm2377_vm4, %v6088_v63, %v4934_v47  ;;  %v6236_v18 = vld [vmem:[%s6217_s9 + $0x8] sm:$0xff] }
 0x3fd   : > { %4956 = vrot.lane.b32.xlu1 %v4955_v11, %s5151_s29  ;;  %v2607_v53 = vpack.c.bf16 %v2585_v14, %v2584_v37  ;;  %v6269_v14 = vld [vmem:[%s6217_s9 + $0x20] sm:$0xff] }
 0x3fe   : > { %4544 = vmatmul.msk.bf16.vlgmr.msra.gmra.mxu3 %vm2641_vm6, %v2606_v0  ;;  %v2497_v21 = vpop.f32.mrf.mxu2 }
 0x3ff   : > { %v2498_v27 = vadd.f32 %v2497_v21, %v6127_v28 }
 0x401   : > { %v2516_v39 = vmax.f32 %v2498_v27, 0.0 }
 0x406   : > { %v2499_v1 = vpop.f32.mrf.mxu2 }
 0x407   : > { %v2500_v54 = vadd.f32 %v2499_v1, %v6127_v28  ;;  %v6258_v1 = vld [vmem:[%s6217_s9 + $0x18] sm:$0xff] }
 0x409   : > { %v2517_v24 = vmax.f32 %v2500_v54, 0.0 }
 0x40b   : > { %v4960_v10 = vpack.i.bf16 %v2517_v24, %v2516_v39 }
 0x40d   : > { %4961 = vrot.lane.b32.xlu2 %v4960_v10, %s5151_s29 }
 0x40e   : > { %4545 = vmatmul.msk.bf16.gmra.mxu3 %vm2641_vm6, %v2607_v53 }
 0x418   : > { %v4937_v42 = vpop.permute.xlu0 %4936 }
 0x419   : > { %v4939_v3 = vunpack.i.h.bf16 %v4937_v42  ;;  %v4938_v56 = vunpack.i.l.bf16 %v4937_v42  ;;  %v6280_v42 = vld [vmem:[%s6217_s9 + $0x28] sm:$0xff] }
 0x41b   : > { %v2587_v6 = vsel %vm2377_vm4, %v6095_v7, %v4939_v3  ;;  %v2586_v28 = vsel %vm2377_vm4, %v6090_v8, %v4938_v56 }
 0x41c   : > { %v2608_v44 = vpack.c.bf16 %v2587_v6, %v2586_v28  ;;  %v6291_v28 = vld [vmem:[%s6217_s9 + $0x30] sm:$0xff] }
 0x41e   : > { %4546 = vmatmul.msk.bf16.gmra.mxu3 %vm2641_vm6, %v2608_v44 }
 0x42f   : > { %v4942_v63 = vpop.permute.xlu1 %4941 }
 0x430   : > { %v4944_v32 = vunpack.i.h.bf16 %v4942_v63  ;;  %v4943_v36 = vunpack.i.l.bf16 %v4942_v63 }
 0x431   : > { %v4947_v25 = vpop.permute.xlu2 %4946 }
 0x432   : > { %v2589_v4 = vsel %vm2377_vm4, %v6104_v49, %v4944_v32  ;;  %v2588_v17 = vsel %vm2377_vm4, %v6097_v29, %v4943_v36  ;;  %v4949_v7 = vunpack.i.h.bf16 %v4947_v25  ;;  %v4948_v51 = vunpack.i.l.bf16 %v4947_v25  ;;  %v6302_v36 = vld [vmem:[%s6217_s9 + $0x38] sm:$0xff]  ;;  %v6313_v25 = vld [vmem:[%s6217_s9 + $0x40] sm:$0xff] }
 0x433   : > { %v2609_v35 = vpack.c.bf16 %v2589_v4, %v2588_v17 }
 0x434   : > { %v2590_v8 = vsel %vm2377_vm4, %v6102_v50, %v4948_v51  ;;  %v2591_v46 = vsel %vm2377_vm4, %v6106_v13, %v4949_v7 }
 0x435   : > { %4547 = vmatmul.msk.bf16.gmra.mxu3 %vm2641_vm6, %v2609_v35  ;;  %v2610_v33 = vpack.c.bf16 %v2591_v46, %v2590_v8  ;;  %v6324_v46 = vld [vmem:[%s6217_s9 + $0x48] sm:$0xff] }
 0x445   : > { %4548 = vmatmul.msk.bf16.gmra.mxu3 %vm2641_vm6, %v2610_v33 }
 0x45f   : > { %v4952_v55 = vpop.permute.xlu0 %4951 }
 0x460   : > { %v4954_v49 = vunpack.i.h.bf16 %v4952_v55  ;;  %v4953_v20 = vunpack.i.l.bf16 %v4952_v55 }
 0x462   : > { %v2593_v29 = vsel %vm2377_vm4, %v6114_v48, %v4954_v49  ;;  %v2592_v38 = vsel %vm2377_vm4, %v6111_v23, %v4953_v20  ;;  %v2265_v48 = vpop.f32.mrf.mxu3  ;;  %v2614_v23 = vld [vmem:[%s6687_s5 + $0x58] sm:$0x1]  ;;  %v6335_v20 = vld [vmem:[%s6217_s9 + $0x50] sm:$0xff] }
 0x463   : > { %v2611_v30 = vpack.c.bf16 %v2593_v29, %v2592_v38  ;;  %v2615_v59 = vunpack.c.l.bf16 %v2614_v23 }
 0x465   : > { %4549 = vmatmul.msk.bf16.gmra.mxu3 %vm2641_vm6, %v2611_v30  ;;  %v6208_v9 = vperm.slane %v2615_v59, 0 }
 0x467   : > { %v4962_v45 = vpop.permute.xlu2 %4961 }
 0x468   : > { %v4964_v22 = vunpack.i.h.bf16 %v4962_v45  ;;  %v4963_v26 = vunpack.i.l.bf16 %v4962_v45  ;;  %v6368_v45 = vld [vmem:[%s6217_s9 + $0x68] sm:$0xff] }
 0x46a   : > { %v2597_v2 = vsel %vm2377_vm4, %v2294_v60, %v4964_v22 }
 0x46f   : > { %v4957_v43 = vpop.permute.xlu1 %4956 }
 0x470   : > { %v4959_v50 = vunpack.i.h.bf16 %v4957_v43  ;;  %v4958_v58 = vunpack.i.l.bf16 %v4957_v43  ;;  %v6346_v43 = vld [vmem:[%s6217_s9 + $0x58] sm:$0xff] }
 0x472   : > { %v2595_v13 = vsel %vm2377_vm4, %v6120_v57, %v4959_v50  ;;  %v2594_v15 = vsel %vm2377_vm4, %v6116_v5, %v4958_v58  ;;  %v2596_v57 = vsel %vm2377_vm4, %v2265_v48, %v4963_v26 }
 0x473   : > { %v2612_v19 = vpack.c.bf16 %v2595_v13, %v2594_v15  ;;  %v2613_v34 = vpack.c.bf16 %v2597_v2, %v2596_v57  ;;  %v6357_v15 = vld [vmem:[%s6217_s9 + $0x60] sm:$0xff]  ;;  %v6381_v57 = vld [vmem:[%s6217_s9 + $0x70] sm:$0xff] }
 0x475   : > { %4550 = vmatmul.msk.bf16.gmra.mxu3 %vm2641_vm6, %v2612_v19 }
 0x481   : > { %v2675_v5 = vpop.f32.mrf.mxu3 }
 0x482   : > { %v6220_v12 = vadd.f32 %v2675_v5, %v6208_v9 }
 0x484   : > { %v2715_v40 = vmax.f32 %v6220_v12, 0.0 }
 0x485   : > { %4551 = vmatmul.msk.bf16.gmra.mxu3 %vm2641_vm6, %v2613_v34 }
 0x486   : > { %2765 = vmatpush.msra.mxu1 %v2715_v40 }
 0x487   : > { %4552 = vmatmul.msk.f32.vlgmr.msra.gmra.mxu1 %vm1531_vm2, %v6224_v61 }
 0x489   : > { %v2677_v62 = vpop.f32.mrf.mxu3 }
 0x48a   : > { %v6232_v16 = vadd.f32 %v2677_v62, %v6208_v9 }
 0x48c   : > { %v2716_v11 = vmax.f32 %v6232_v16, 0.0 }
 0x48e   : > { %2788 = vmatpush.msrb.mxu1 %v2716_v11 }
 0x48f   : > { %4553 = vmatmul.msk.f32.vlgmr.msrb.gmra.mxu1 %vm1531_vm2, %v6236_v18 }
 0x491   : > { %v2680_v41 = vpop.f32.mrf.mxu3 }
 0x492   : > { %v6243_v0 = vadd.f32 %v2680_v41, %v6208_v9 }
 0x494   : > { %v2717_v21 = vmax.f32 %v6243_v0, 0.0 }
 0x496   : > { %2811 = vmatpush.msra.mxu1 %v2717_v21 }
 0x497   : > { %4554 = vmatmul.msk.f32.vlgmr.msra.gmra.mxu1 %vm1531_vm2, %v6247_v31 }
 0x499   : > { %v2682_v27 = vpop.f32.mrf.mxu3 }
 0x49a   : > { %v6254_v47 = vadd.f32 %v2682_v27, %v6208_v9  ;;  %v6393_v27 = vld [vmem:[%s6217_s9 + $0x78] sm:$0xff] }
 0x49c   : > { %v2718_v52 = vmax.f32 %v6254_v47, 0.0 }
 0x49e   : > { %2834 = vmatpush.msrb.mxu1 %v2718_v52 }
 0x49f   : > { %4555 = vmatmul.msk.f32.vlgmr.msrb.gmra.mxu1 %vm1531_vm2, %v6258_v1 }
 0x4a1   : > { %v2685_v39 = vpop.f32.mrf.mxu3 }
 0x4a2   : > { %v6265_v54 = vadd.f32 %v2685_v39, %v6208_v9 }
 0x4a4   : > { %v2719_v37 = vmax.f32 %v6265_v54, 0.0 }
 0x4a6   : > { %2857 = vmatpush.msra.mxu1 %v2719_v37 }
 0x4a7   : > { %4556 = vmatmul.msk.f32.vlgmr.msra.gmra.mxu1 %vm1531_vm2, %v6269_v14 }
 0x4a9   : > { %v2687_v24 = vpop.f32.mrf.mxu3 }
 0x4aa   : > { %v6276_v10 = vadd.f32 %v2687_v24, %v6208_v9 }
 0x4ac   : > { %v2720_v53 = vmax.f32 %v6276_v10, 0.0 }
 0x4ae   : > { %2880 = vmatpush.msrb.mxu1 %v2720_v53 }
 0x4af   : > { %4557 = vmatmul.msk.f32.vlgmr.msrb.gmra.mxu1 %vm1531_vm2, %v6280_v42 }
 0x4b8   : > { %v2690_v3 = vpop.f32.mrf.mxu3 }
 0x4b9   : > { %v6287_v56 = vadd.f32 %v2690_v3, %v6208_v9 }
 0x4bb   : > { %v2721_v6 = vmax.f32 %v6287_v56, 0.0 }
 0x4bd   : > { %2903 = vmatpush.msra.mxu1 %v2721_v6 }
 0x4be   : > { %4558 = vmatmul.msk.f32.vlgmr.msra.gmra.mxu1 %vm1531_vm2, %v6291_v28 }
 0x4c0   : > { %v2692_v44 = vpop.f32.mrf.mxu3 }
 0x4c1   : > { %v6298_v63 = vadd.f32 %v2692_v44, %v6208_v9 }
 0x4c3   : > { %v2722_v32 = vmax.f32 %v6298_v63, 0.0 }
 0x4c5   : > { %2926 = vmatpush.msrb.mxu1 %v2722_v32 }
 0x4c6   : > { %4559 = vmatmul.msk.f32.vlgmr.msrb.gmra.mxu1 %vm1531_vm2, %v6302_v36 }
 0x4c8   : > { %v2695_v4 = vpop.f32.mrf.mxu3 }
 0x4c9   : > { %v6309_v17 = vadd.f32 %v2695_v4, %v6208_v9 }
 0x4cb   : > { %v2723_v35 = vmax.f32 %v6309_v17, 0.0 }
 0x4cd   : > { %2949 = vmatpush.msra.mxu1 %v2723_v35 }
 0x4ce   : > { %4560 = vmatmul.msk.f32.vlgmr.msra.gmra.mxu1 %vm1531_vm2, %v6313_v25 }
 0x4d0   : > { %v2697_v7 = vpop.f32.mrf.mxu3 }
 0x4d1   : > { %v6320_v51 = vadd.f32 %v2697_v7, %v6208_v9 }
 0x4d3   : > { %v2724_v8 = vmax.f32 %v6320_v51, 0.0 }
 0x4d5   : > { %2972 = vmatpush.msrb.mxu1 %v2724_v8 }
 0x4d6   : > { %4561 = vmatmul.msk.f32.vlgmr.msrb.gmra.mxu1 %vm1531_vm2, %v6324_v46 }
 0x4e8   : > { %v2700_v33 = vpop.f32.mrf.mxu3 }
 0x4e9   : > { %v6331_v55 = vadd.f32 %v2700_v33, %v6208_v9 }
 0x4eb   : > { %v2725_v49 = vmax.f32 %v6331_v55, 0.0 }
 0x4ed   : > { %2995 = vmatpush.msra.mxu1 %v2725_v49 }
 0x4ee   : > { %4562 = vmatmul.msk.f32.vlgmr.msra.gmra.mxu1 %vm1531_vm2, %v6335_v20 }
 0x4f0   : > { %v2702_v29 = vpop.f32.mrf.mxu3 }
 0x4f1   : > { %v6342_v38 = vadd.f32 %v2702_v29, %v6208_v9 }
 0x4f3   : > { %v2726_v30 = vmax.f32 %v6342_v38, 0.0  ;;  %v4671_v38 = vld [vmem:[%s6688_s6] sm:$0xff] }
 0x4f5   : > { %3018 = vmatpush.msrb.mxu1 %v2726_v30 }
 0x4f6   : > { %4563 = vmatmul.msk.f32.vlgmr.msrb.gmra.mxu1 %vm1531_vm2, %v6346_v43 }
 0x4f8   : > { %v2705_v50 = vpop.f32.mrf.mxu3 }
 0x4f9   : > { %v6353_v58 = vadd.f32 %v2705_v50, %v6208_v9 }
 0x4fb   : > { %v2727_v13 = vmax.f32 %v6353_v58, 0.0 }
 0x4fd   : > { %3041 = vmatpush.msra.mxu1 %v2727_v13 }
 0x4fe   : > { %4564 = vmatmul.msk.f32.vlgmr.msra.gmra.mxu1 %vm1531_vm2, %v6357_v15 }
 0x500   : > { %v2707_v19 = vpop.f32.mrf.mxu3 }
 0x501   : > { %v6364_v48 = vadd.f32 %v2707_v19, %v6208_v9 }
 0x503   : > { %v2728_v23 = vmax.f32 %v6364_v48, 0.0 }
 0x504   : > { %v2767_v59 = vpop.f32.mrf.mxu1 }
 0x505   : > { %3064 = vmatpush.msrb.mxu1 %v2728_v23  ;;  %3130 = vmatpush.msrb.mxu3 %v2767_v59 }
 0x506   : > { %4565 = vmatmul.msk.f32.vlgmr.msrb.gmra.mxu1 %vm1531_vm2, %v6368_v45  ;;  %4568 = vmatmul.msk.f32.vlgmr.msrb.gmra.mxu3 %vm1531_vm2, %v6224_v61 }
 0x508   : > { %v2710_v22 = vpop.f32.mrf.mxu3 }
 0x509   : > { %v6377_v26 = vadd.f32 %v2710_v22, %v6208_v9 }
 0x50b   : > { %v2729_v60 = vmax.f32 %v6377_v26, 0.0 }
 0x50c   : > { %v2790_v2 = vpop.f32.mrf.mxu1 }
 0x50d   : > { %v4965_v5 = vpack.i.bf16 %v2790_v2, %v2767_v59  ;;  %3087 = vmatpush.msra.mxu1 %v2729_v60 }
 0x50e   : > { %4566 = vmatmul.msk.f32.vlgmr.msra.gmra.mxu1 %vm1531_vm2, %v6381_v57 }
 0x50f   : > { %4966 = vrot.lane.b32.xlu0 %v4965_v5, %s5151_s29  ;;  %3150 = vmatpush.msrb.mxu1 %v2790_v2 }
 0x510   : > { %v2712_v34 = vpop.f32.mrf.mxu3 }
 0x511   : > { %v6389_v62 = vadd.f32 %v2712_v34, %v6208_v9 }
 0x513   : > { %v2730_v41 = vmax.f32 %v6389_v62, 0.0 }
 0x514   : > { %v2813_v39 = vpop.f32.mrf.mxu1 }
 0x515   : > { %3110 = vmatpush.msrb.mxu2 %v2730_v41 }
 0x516   : > { %4567 = vmatmul.msk.f32.vlgmr.msrb.gmra.mxu2 %vm1531_vm2, %v6393_v27  ;;  %4569 = vmatmul.msk.f32.vlgmr.msrb.gmra.mxu1 %vm1531_vm2, %v6236_v18 }
 0x517   : > { %3170 = vmatpush.msra.mxu2 %v2813_v39 }
 0x51c   : > { %v2836_v24 = vpop.f32.mrf.mxu1 }
 0x51d   : > { %v4980_v3 = vpack.i.bf16 %v2836_v24, %v2813_v39  ;;  %3190 = vmatpush.msra.mxu3 %v2836_v24 }
 0x51e   : > { %4570 = vmatmul.msk.f32.vlgmr.msra.gmra.mxu2 %vm1531_vm2, %v6247_v31  ;;  %4571 = vmatmul.msk.f32.vlgmr.msra.gmra.mxu3 %vm1531_vm2, %v6258_v1 }
 0x51f   : > { %4981 = vrot.lane.b32.xlu0 %v4980_v3, %s5151_s29 }
 0x524   : > { %v2859_v9 = vpop.f32.mrf.mxu1 }
 0x525   : > { %3210 = vmatpush.msra.mxu1 %v2859_v9 }
 0x526   : > { %4572 = vmatmul.msk.f32.vlgmr.msra.gmra.mxu1 %vm1531_vm2, %v6269_v14 }
 0x52c   : > { %v2882_v44 = vpop.f32.mrf.mxu1 }
 0x52d   : > { %v4995_v4 = vpack.i.bf16 %v2882_v44, %v2859_v9  ;;  %3230 = vmatpush.msrb.mxu2 %v2882_v44 }
 0x52e   : > { %4573 = vmatmul.msk.f32.vlgmr.msrb.gmra.mxu2 %vm1531_vm2, %v6280_v42 }
 0x52f   : > { %4996 = vrot.lane.b32.xlu0 %v4995_v4, %s5151_s29 }
 0x53b   : > { %v2905_v7 = vpop.f32.mrf.mxu1 }
 0x53c   : > { %3250 = vmatpush.msrb.mxu3 %v2905_v7 }
 0x53d   : > { %4574 = vmatmul.msk.f32.vlgmr.msrb.gmra.mxu3 %vm1531_vm2, %v6291_v28 }
 0x543   : > { %v2928_v33 = vpop.f32.mrf.mxu1 }
 0x544   : > { %v5010_v29 = vpack.i.bf16 %v2928_v33, %v2905_v7  ;;  %3270 = vmatpush.msrb.mxu1 %v2928_v33 }
 0x545   : > { %4575 = vmatmul.msk.f32.vlgmr.msrb.gmra.mxu1 %vm1531_vm2, %v6302_v36 }
 0x546   : > { %5011 = vrot.lane.b32.xlu0 %v5010_v29, %s5151_s29 }
 0x54b   : > { %v2951_v50 = vpop.f32.mrf.mxu1 }
 0x54c   : > { %3290 = vmatpush.msra.mxu2 %v2951_v50 }
 0x54d   : > { %4576 = vmatmul.msk.f32.vlgmr.msra.gmra.mxu2 %vm1531_vm2, %v6313_v25 }
 0x553   : > { %v2974_v19 = vpop.f32.mrf.mxu1 }
 0x554   : > { %v5025_v59 = vpack.i.bf16 %v2974_v19, %v2951_v50  ;;  %3310 = vmatpush.msra.mxu3 %v2974_v19 }
 0x555   : > { %4577 = vmatmul.msk.f32.vlgmr.msra.gmra.mxu3 %vm1531_vm2, %v6324_v46 }
 0x556   : > { %5026 = vrot.lane.b32.xlu0 %v5025_v59, %s5151_s29 }
 0x56b   : > { %v2997_v22 = vpop.f32.mrf.mxu1 }
 0x56c   : > { %3330 = vmatpush.msra.mxu1 %v2997_v22 }
 0x56d   : > { %4578 = vmatmul.msk.f32.vlgmr.msra.gmra.mxu1 %vm1531_vm2, %v6335_v20 }
 0x573   : > { %v3020_v2 = vpop.f32.mrf.mxu1 }
 0x574   : > { %v5040_v5 = vpack.i.bf16 %v3020_v2, %v2997_v22  ;;  %3350 = vmatpush.msrb.mxu2 %v3020_v2 }
 0x575   : > { %4579 = vmatmul.msk.f32.vlgmr.msrb.gmra.mxu2 %vm1531_vm2, %v6346_v43 }
 0x576   : > { %5041 = vrot.lane.b32.xlu0 %v5040_v5, %s5151_s29 }
 0x57b   : > { %v3043_v34 = vpop.f32.mrf.mxu1 }
 0x57c   : > { %3370 = vmatpush.msrb.mxu3 %v3043_v34 }
 0x57d   : > { %4580 = vmatmul.msk.f32.vlgmr.msrb.gmra.mxu3 %vm1531_vm2, %v6357_v15 }
 0x583   : > { %v3066_v39 = vpop.f32.mrf.mxu1 }
 0x584   : > { %v5055_v24 = vpack.i.bf16 %v3066_v39, %v3043_v34  ;;  %3390 = vmatpush.msrb.mxu1 %v3066_v39 }
 0x585   : > { %4581 = vmatmul.msk.f32.vlgmr.msrb.gmra.mxu1 %vm1531_vm2, %v6368_v45 }
 0x586   : > { %5056 = vrot.lane.b32.xlu0 %v5055_v24, %s5151_s29 }
 0x589   : > { %v3132_v3 = vpop.f32.mrf.mxu3 }
 0x58a   : > { %3450 = vmatpush.msrb.mxu0 %v3132_v3 }
 0x58b   : > { %v3089_v9 = vpop.f32.mrf.mxu1  ;;  %4584 = vmatmul.msk.f32.vlgmr.msrb.gmra.mxu0 %vm1531_vm2, %v6224_v61 }
 0x58c   : > { %3410 = vmatpush.msra.mxu2 %v3089_v9 }
 0x58d   : > { %4582 = vmatmul.msk.f32.vlgmr.msra.gmra.mxu2 %vm1531_vm2, %v6381_v57 }
 0x593   : > { %v3152_v44 = vpop.f32.mrf.mxu1 }
 0x594   : > { %v4970_v4 = vpack.i.bf16 %v3152_v44, %v3132_v3  ;;  %3470 = vmatpush.msra.mxu1 %v3152_v44 }
 0x595   : > { %4585 = vmatmul.msk.f32.vlgmr.msra.gmra.mxu1 %vm1531_vm2, %v6236_v18 }
 0x596   : > { %4971 = vrot.lane.b32.xlu1 %v4970_v4, %s5152_s13 }
 0x599   : > { %v3112_v7 = vpop.f32.mrf.mxu2 }
 0x59a   : > { %v5070_v33 = vpack.i.bf16 %v3112_v7, %v3089_v9  ;;  %3430 = vmatpush.msra.mxu3 %v3112_v7 }
 0x59b   : > { %4583 = vmatmul.msk.f32.vlgmr.msra.gmra.mxu3 %vm1531_vm2, %v6393_v27 }
 0x59c   : > { %5071 = vrot.lane.b32.xlu0 %v5070_v33, %s5151_s29 }
 0x5a1   : > { %v3172_v61 = vpop.f32.mrf.mxu2  ;;  %v3192_v29 = vpop.f32.mrf.mxu3 }
 0x5a2   : > { %3490 = vmatpush.msrb.mxu2 %v3172_v61  ;;  %v4985_v50 = vpack.i.bf16 %v3192_v29, %v3172_v61  ;;  %3510 = vmatpush.msrb.mxu3 %v3192_v29  ;;  %v4668_v61 = vld [vmem:[%s6687_s5 + $0x88] sm:$0xff]  ;;  %v4667_v29 = vld [vmem:[%s6687_s5 + $0x80] sm:$0xff] }
 0x5a3   : > { %4586 = vmatmul.msk.f32.vlgmr.msrb.gmra.mxu2 %vm1531_vm2, %v6247_v31  ;;  %v3212_v18 = vpop.f32.mrf.mxu1  ;;  %4587 = vmatmul.msk.f32.vlgmr.msrb.gmra.mxu3 %vm1531_vm2, %v6258_v1 }
 0x5a4   : > { %3530 = vmatpush.msra.mxu0 %v3212_v18  ;;  %4986 = vrot.lane.b32.xlu1 %v4985_v50, %s5152_s13  ;;  %v4666_v50 = vld [vmem:[%s6687_s5 + $0x78] sm:$0xff] }
 0x5a5   : > { %4588 = vmatmul.msk.f32.vlgmr.msra.gmra.mxu0 %vm1531_vm2, %v6269_v14 }
 0x5b1   : > { %v3232_v19 = vpop.f32.mrf.mxu2 }
 0x5b2   : > { %v5000_v59 = vpack.i.bf16 %v3232_v19, %v3212_v18  ;;  %3550 = vmatpush.msrb.mxu1 %v3232_v19  ;;  %v4665_v19 = vld [vmem:[%s6687_s5 + $0x70] sm:$0xff] }
 0x5b3   : > { %4589 = vmatmul.msk.f32.vlgmr.msrb.gmra.mxu1 %vm1531_vm2, %v6280_v42 }
 0x5b4   : > { %5001 = vrot.lane.b32.xlu1 %v5000_v59, %s5152_s13 }
 0x5c0   : > { %v3252_v22 = vpop.f32.mrf.mxu3 }
 0x5c1   : > { %3570 = vmatpush.msra.mxu2 %v3252_v22 }
 0x5c2   : > { %v3272_v31 = vpop.f32.mrf.mxu1  ;;  %4590 = vmatmul.msk.f32.vlgmr.msra.gmra.mxu2 %vm1531_vm2, %v6291_v28 }
 0x5c3   : > { %v5015_v1 = vpack.i.bf16 %v3272_v31, %v3252_v22  ;;  %3590 = vmatpush.msra.mxu3 %v3272_v31  ;;  %v4664_v31 = vld [vmem:[%s6687_s5 + $0x68] sm:$0xff] }
 0x5c4   : > { %4591 = vmatmul.msk.f32.vlgmr.msra.gmra.mxu3 %vm1531_vm2, %v6302_v36 }
 0x5c5   : > { %5016 = vrot.lane.b32.xlu1 %v5015_v1, %s5152_s13  ;;  %v4663_v1 = vld [vmem:[%s6687_s5 + $0x60] sm:$0xff] }
 0x5d0   : > { %v3292_v14 = vpop.f32.mrf.mxu2 }
 0x5d1   : > { %3610 = vmatpush.msrb.mxu0 %v3292_v14 }
 0x5d2   : > { %4592 = vmatmul.msk.f32.vlgmr.msrb.gmra.mxu0 %vm1531_vm2, %v6313_v25 }
 0x5d8   : > { %v3312_v42 = vpop.f32.mrf.mxu3 }
 0x5d9   : > { %v5030_v2 = vpack.i.bf16 %v3312_v42, %v3292_v14  ;;  %3630 = vmatpush.msra.mxu1 %v3312_v42 }
 0x5da   : > { %4593 = vmatmul.msk.f32.vlgmr.msra.gmra.mxu1 %vm1531_vm2, %v6324_v46 }
 0x5db   : > { %5031 = vrot.lane.b32.xlu1 %v5030_v2, %s5152_s13 }
 0x5ea   : > { %v3332_v28 = vpop.f32.mrf.mxu1 }
 0x5eb   : > { %3650 = vmatpush.msrb.mxu2 %v3332_v28 }
 0x5ec   : > { %4594 = vmatmul.msk.f32.vlgmr.msrb.gmra.mxu2 %vm1531_vm2, %v6335_v20 }
 0x5f8   : > { %v3352_v36 = vpop.f32.mrf.mxu2 }
 0x5f9   : > { %v5045_v5 = vpack.i.bf16 %v3352_v36, %v3332_v28  ;;  %3670 = vmatpush.msrb.mxu3 %v3352_v36  ;;  %v4967_v28 = vpop.permute.xlu0 %4966 }
 0x5fa   : > { %4595 = vmatmul.msk.f32.vlgmr.msrb.gmra.mxu3 %vm1531_vm2, %v6346_v43 }
 0x5fb   : > { %5046 = vrot.lane.b32.xlu1 %v5045_v5, %s5152_s13  ;;  %v4969_v5 = vunpack.i.h.bf16 %v4967_v28 }
 0x600   : > { %v3372_v25 = vpop.f32.mrf.mxu3 }
 0x601   : > { %3690 = vmatpush.msra.mxu0 %v3372_v25 }
 0x602   : > { %v3392_v34 = vpop.f32.mrf.mxu1  ;;  %4596 = vmatmul.msk.f32.vlgmr.msra.gmra.mxu0 %vm1531_vm2, %v6357_v15 }
 0x603   : > { %v5060_v46 = vpack.i.bf16 %v3392_v34, %v3372_v25  ;;  %3710 = vmatpush.msrb.mxu1 %v3392_v34  ;;  %v4968_v25 = vunpack.i.l.bf16 %v4967_v28 }
 0x604   : > { %4597 = vmatmul.msk.f32.vlgmr.msrb.gmra.mxu1 %vm1531_vm2, %v6368_v45 }
 0x605   : > { %5061 = vrot.lane.b32.xlu1 %v5060_v46, %s5152_s13 }
 0x608   : > { %v3452_v20 = vpop.f32.mrf.mxu0  ;;  %v4972_v36 = vpop.permute.xlu1 %4971 }
 0x609   : > { %v4974_v34 = vunpack.i.h.bf16 %v4972_v36  ;;  %v4973_v46 = vunpack.i.l.bf16 %v4972_v36 }
 0x610   : > { %v3412_v39 = vpop.f32.mrf.mxu2 }
 0x611   : > { %3730 = vmatpush.msra.mxu2 %v3412_v39 }
 0x612   : > { %v3472_v24 = vpop.f32.mrf.mxu1  ;;  %4598 = vmatmul.msk.f32.vlgmr.msra.gmra.mxu2 %vm1531_vm2, %v6381_v57  ;;  %v4670_v57 = vld [vmem:[%s6687_s5 + $0x98] sm:$0xff] }
 0x613   : > { %v4975_v43 = vpack.i.bf16 %v3472_v24, %v3452_v20  ;;  %4071 = vmatpush.bf16.msrb.mxu0 %v4670_v57  ;;  %v3947_v24 = vsel %vm2377_vm4, %v2715_v40, %v4968_v25  ;;  %v4982_v57 = vpop.permute.xlu0 %4981 }
 0x614   : > { %v4984_v12 = vunpack.i.h.bf16 %v4982_v57  ;;  %v4983_v40 = vunpack.i.l.bf16 %v4982_v57 }
 0x615   : > { %4976 = vrot.lane.b32.xlu2 %v4975_v43, %s5153_s14 }
 0x61b   : > { %v4997_v47 = vpop.permute.xlu0 %4996 }
 0x61c   : > { %v4999_v0 = vunpack.i.h.bf16 %v4997_v47  ;;  %v4998_v25 = vunpack.i.l.bf16 %v4997_v47 }
 0x61e   : > { %v3432_v3 = vpop.f32.mrf.mxu3 }
 0x61f   : > { %v5075_v15 = vpack.i.bf16 %v3432_v3, %v3412_v39  ;;  %3750 = vmatpush.msra.mxu3 %v3432_v3  ;;  %v3948_v39 = vsel %vm2377_vm4, %v2716_v11, %v4969_v5 }
 0x620   : > { %4599 = vmatmul.msk.f32.vlgmr.msra.gmra.mxu3 %vm1531_vm2, %v6393_v27  ;;  %v4669_v27 = vld [vmem:[%s6687_s5 + $0x90] sm:$0xff] }
 0x621   : > { %5076 = vrot.lane.b32.xlu1 %v5075_v15, %s5152_s13  ;;  %4072 = vmatpush.bf16.msrb.mxu0 %v4669_v27  ;;  %v3964_v15 = vsel %vm2641_vm6, %v3948_v39, %v4974_v34  ;;  %v3952_v39 = vsel %vm2377_vm4, %v2720_v53, %v4999_v0  ;;  %s340_s13 = sand.u32 1, %s5139_s25  }
 0x622   : > { %v3532_v4 = vpop.f32.mrf.mxu0  ;;  %s4382_s29 = sshll.u32 %s340_s13, 7  ;;  %s4253_s22 = scalar_lea.sflag [#allocation3], %s340_s13 }
 0x623   : > { %s6626_s15 = scalar_lea.vmem [#allocation2], %s4382_s29  ;;  %s5105_s29 = scalar_lea.hbm %s6689_s7, 256 }
 0x624   : > { %s4265_s20 = sshll.u32 %s6626_s15, 4  ;;  %p5107_p1 = scmp.lt.s32.totalorder %s5105_s29, %s5101_s8  ;;  %s4266_s20 = int_to_ptr.vmem [resolvable:$true] %s4265_s20 }
 0x625   : > { %4073 = vmatpush.bf16.msrb.mxu0 %v4668_v61 }
 0x626   : > { %v3492_v45 = vpop.f32.mrf.mxu2  ;;  %v3512_v9 = vpop.f32.mrf.mxu3  ;;  %p5108_p2 = por %p5107_p1, %p5106_p0 }
 0x627   : > { %v4990_v44 = vpack.i.bf16 %v3512_v9, %v3492_v45  ;;  %v3963_v45 = vsel %vm2641_vm6, %v3947_v24, %v4973_v46  ;;  %v3951_v24 = vsel %vm2377_vm4, %v2719_v37, %v4998_v25 }
 0x628   : > { %p5109_p3 = pnand %p5108_p2, %p5104_p13 }
 0x629   : > { %4991 = vrot.lane.b32.xlu2 %v4990_v44, %s5153_s14  ;;  %4074 = vmatpush.bf16.msrb.mxu0 %v4667_v29 }
 0x62d   : > { %4075 = vmatpush.bf16.msrb.mxu0 %v4666_v50 }
 0x630   : > { %v3552_v7 = vpop.f32.mrf.mxu1 }
 0x631   : > { %v5005_v33 = vpack.i.bf16 %v3552_v7, %v3532_v4  ;;  %4076 = vmatpush.bf16.msrb.mxu0 %v4665_v19 }
 0x633   : > { %5006 = vrot.lane.b32.xlu2 %v5005_v33, %s5153_s14  ;;  %v4987_v33 = vpop.permute.xlu1 %4986 }
 0x634   : > { %v4989_v29 = vunpack.i.h.bf16 %v4987_v33  ;;  %v4988_v50 = vunpack.i.l.bf16 %v4987_v33 }
 0x635   : > { %4077 = vmatpush.bf16.msrb.mxu0 %v4664_v31 }
 0x639   : > { %4078 = vmatpush.bf16.msrb.mxu0 %v4663_v1 }
 0x645   : > { %v3572_v18 = vpop.f32.mrf.mxu2 }
 0x647   : > { %v3592_v59 = vpop.f32.mrf.mxu3 }
 0x648   : > { %v5020_v22 = vpack.i.bf16 %v3592_v59, %v3572_v18  ;;  %v3950_v59 = vsel %vm2377_vm4, %v2718_v52, %v4984_v12  ;;  %v5002_v52 = vpop.permute.xlu1 %5001 }
 0x649   : > { %v5003_v34 = vunpack.i.l.bf16 %v5002_v52 }
 0x64a   : > { %5021 = vrot.lane.b32.xlu2 %v5020_v22, %s5153_s14  ;;  %v3949_v22 = vsel %vm2377_vm4, %v2717_v21, %v4983_v40  ;;  %v5004_v21 = vunpack.i.h.bf16 %v5002_v52 }
 0x64f   : > { %v3612_v14 = vpop.f32.mrf.mxu0 }
 0x657   : > { %v3632_v42 = vpop.f32.mrf.mxu1 }
 0x658   : > { %v5035_v2 = vpack.i.bf16 %v3632_v42, %v3612_v14  ;;  %v3966_v14 = vsel %vm2641_vm6, %v3950_v59, %v4989_v29  ;;  %v3965_v42 = vsel %vm2641_vm6, %v3949_v22, %v4988_v50 }
 0x65a   : > { %5036 = vrot.lane.b32.xlu2 %v5035_v2, %s5153_s14 }
 0x66f   : > { %v4977_v20 = vpop.permute.xlu2 %4976  ;;  %v3652_v7 = vpop.f32.mrf.mxu2 }
 0x670   : > { %v4979_v43 = vunpack.i.h.bf16 %v4977_v20  ;;  %v4978_v3 = vunpack.i.l.bf16 %v4977_v20 }
 0x672   : > { %v3981_v9 = vsel %vm3979_vm7, %v3964_v15, %v4979_v43  ;;  %v3980_v44 = vsel %vm3979_vm7, %v3963_v45, %v4978_v3  ;;  %v3968_v43 = vsel %vm2641_vm6, %v3952_v39, %v5004_v21  ;;  %v3967_v3 = vsel %vm2641_vm6, %v3951_v24, %v5003_v34 }
 0x673   : > { %v4012_v4 = vpack.c.bf16 %v3981_v9, %v3980_v44  ;;  %v5012_v44 = vpop.permute.xlu0 %5011 }
 0x674   : > { %v5013_v10 = vunpack.i.l.bf16 %v5012_v44 }
 0x675   : > { %4079 = vmatmul.bf16.vlgmr.msrb.gmra.mxu0 %v4012_v4  ;;  %v5017_v4 = vpop.permute.xlu1 %5016 }
 0x676   : > { %v5019_v53 = vunpack.i.h.bf16 %v5017_v4  ;;  %v5018_v57 = vunpack.i.l.bf16 %v5017_v4  ;;  %v3953_v12 = vsel %vm2377_vm4, %v2721_v6, %v5013_v10 }
 0x678   : > { %v3969_v29 = vsel %vm2641_vm6, %v3953_v12, %v5018_v57 }
 0x67b   : > { %v5027_v63 = vpop.permute.xlu0 %5026 }
 0x67c   : > { %v5029_v59 = vunpack.i.h.bf16 %v5027_v63  ;;  %v5028_v56 = vunpack.i.l.bf16 %v5027_v63 }
 0x67d   : > { %v3672_v16 = vpop.f32.mrf.mxu3 }
 0x67e   : > { %v5050_v11 = vpack.i.bf16 %v3672_v16, %v3652_v7  ;;  %v5014_v7 = vunpack.i.h.bf16 %v5012_v44 }
 0x67f   : > { %v3692_v27 = vpop.f32.mrf.mxu0 }
 0x680   : > { %5051 = vrot.lane.b32.xlu2 %v5050_v11, %s5153_s14  ;;  %v3954_v33 = vsel %vm2377_vm4, %v2722_v32, %v5014_v7  ;;  %v5032_v32 = vpop.permute.xlu1 %5031 }
 0x681   : > { %v3712_v61 = vpop.f32.mrf.mxu1  ;;  %v5034_v22 = vunpack.i.h.bf16 %v5032_v32  ;;  %v5033_v6 = vunpack.i.l.bf16 %v5032_v32 }
 0x682   : > { %v5065_v19 = vpack.i.bf16 %v3712_v61, %v3692_v27  ;;  %v3970_v61 = vsel %vm2641_vm6, %v3954_v33, %v5019_v53 }
 0x683   : > { %v4992_v18 = vpop.permute.xlu2 %4991  ;;  %v5042_v0 = vpop.permute.xlu0 %5041 }
 0x684   : > { %v4994_v31 = vunpack.i.h.bf16 %v4992_v18  ;;  %v4993_v1 = vunpack.i.l.bf16 %v4992_v18  ;;  %v5044_v25 = vunpack.i.h.bf16 %v5042_v0 }
 0x686   : > { %v3982_v2 = vsel %vm3979_vm7, %v3965_v42, %v4993_v1  ;;  %v3983_v28 = vsel %vm3979_vm7, %v3966_v14, %v4994_v31  ;;  %v3956_v1 = vsel %vm2377_vm4, %v2724_v8, %v5029_v59  ;;  %v3955_v14 = vsel %vm2377_vm4, %v2723_v35, %v5028_v56  ;;  %v4672_v35 = vld [vmem:[%s6688_s6 + $0x8] sm:$0xff] }
 0x687   : > { %v4013_v36 = vpack.c.bf16 %v3983_v28, %v3982_v2  ;;  %v3972_v28 = vsel %vm2641_vm6, %v3956_v1, %v5034_v22  ;;  %v5043_v8 = vunpack.i.l.bf16 %v5042_v0  ;;  %4193 = vmatpush.bf16.msra.mxu1 %v4672_v35  ;;  %4678 = vmatpush.bf16.msrb.mxu3 %v4672_v35 }
 0x688   : > { %5066 = vrot.lane.b32.xlu2 %v5065_v19, %s5153_s14  ;;  %v5047_v51 = vpop.permute.xlu1 %5046 }
 0x689   : > { %4084 = vmatmul.bf16.gmra.mxu0 %v4013_v36  ;;  %v3971_v36 = vsel %vm2641_vm6, %v3955_v14, %v5033_v6  ;;  %v5049_v21 = vunpack.i.h.bf16 %v5047_v51  ;;  %v5048_v17 = vunpack.i.l.bf16 %v5047_v51 }
 0x68b   : > { %4194 = vmatpush.bf16.msra.mxu1 %v4671_v38  ;;  %4679 = vmatpush.bf16.msrb.mxu3 %v4671_v38  ;;  %v5057_v55 = vpop.permute.xlu0 %5056 }
 0x68c   : > { %v5059_v44 = vunpack.i.h.bf16 %v5057_v55  ;;  %v5058_v4 = vunpack.i.l.bf16 %v5057_v55 }
 0x68d   : > { %v5007_v5 = vpop.permute.xlu2 %5006 }
 0x68e   : > { %v5009_v46 = vunpack.i.h.bf16 %v5007_v5  ;;  %v5008_v20 = vunpack.i.l.bf16 %v5007_v5  ;;  %v3960_v57 = vsel %vm2377_vm4, %v2728_v23, %v5059_v44 }
 0x690   : > { %v3984_v15 = vsel %vm3979_vm7, %v3967_v3, %v5008_v20  ;;  %v3985_v45 = vsel %vm3979_vm7, %v3968_v43, %v5009_v46  ;;  %v3958_v46 = vsel %vm2377_vm4, %v2726_v30, %v5044_v25  ;;  %v3957_v20 = vsel %vm2377_vm4, %v2725_v49, %v5043_v8  ;;  %v5062_v49 = vpop.permute.xlu1 %5061 }
 0x691   : > { %v4014_v9 = vpack.c.bf16 %v3985_v45, %v3984_v15  ;;  %v3974_v43 = vsel %vm2641_vm6, %v3958_v46, %v5049_v21  ;;  %v3973_v3 = vsel %vm2641_vm6, %v3957_v20, %v5048_v17  ;;  %v5064_v7 = vunpack.i.h.bf16 %v5062_v49 }
 0x692   : > { %v5063_v10 = vunpack.i.l.bf16 %v5062_v49 }
 0x695   : > { %v3732_v16 = vpop.f32.mrf.mxu2 }
 0x699   : > { %4089 = vmatmul.bf16.gmra.mxu0 %v4014_v9 }
 0x6a3   : > { %v3752_v54 = vpop.f32.mrf.mxu3 }
 0x6a4   : > { %v5080_v11 = vpack.i.bf16 %v3752_v54, %v3732_v16  ;;  %v5022_v37 = vpop.permute.xlu2 %5021  ;;  %v3959_v54 = vsel %vm2377_vm4, %v2727_v13, %v5058_v4  ;;  %v5072_v13 = vpop.permute.xlu0 %5071 }
 0x6a5   : > { %v5024_v40 = vunpack.i.h.bf16 %v5022_v37  ;;  %v5023_v27 = vunpack.i.l.bf16 %v5022_v37  ;;  %v3975_v37 = vsel %vm2641_vm6, %v3959_v54, %v5063_v10  ;;  %v5073_v63 = vunpack.i.l.bf16 %v5072_v13 }
 0x6a6   : > { %5081 = vrot.lane.b32.xlu2 %v5080_v11, %s5153_s14  ;;  %v3976_v11 = vsel %vm2641_vm6, %v3960_v57, %v5064_v7 }
 0x6a7   : > { %v3986_v50 = vsel %vm3979_vm7, %v3969_v29, %v5023_v27  ;;  %v3987_v18 = vsel %vm3979_vm7, %v3970_v61, %v5024_v40  ;;  %v4020_v27 = vld [vmem:[%s6687_s5 + $0xa0] sm:$0x1]  ;;  %v3961_v14 = vsel %vm2377_vm4, %v2729_v60, %v5073_v63 }
 0x6a8   : > { %v4015_v19 = vpack.c.bf16 %v3987_v18, %v3986_v50  ;;  %v4021_v48 = vunpack.c.l.bf16 %v4020_v27  ;;  %v5077_v50 = vpop.permute.xlu1 %5076 }
 0x6a9   : > { %v5079_v56 = vunpack.i.h.bf16 %v5077_v50  ;;  %v5078_v22 = vunpack.i.l.bf16 %v5077_v50 }
 0x6aa   : > { %4094 = vmatmul.bf16.gmra.mxu0 %v4015_v19  ;;  %v6587_v61 = vperm.slane %v4021_v48, 0  ;;  %v5074_v19 = vunpack.i.h.bf16 %v5072_v13 }
 0x6ac   : > { %v3962_v1 = vsel %vm2377_vm4, %v2730_v41, %v5074_v19 }
 0x6b4   : > { %v5037_v31 = vpop.permute.xlu2 %5036 }
 0x6b5   : > { %v5039_v42 = vunpack.i.h.bf16 %v5037_v31  ;;  %v5038_v2 = vunpack.i.l.bf16 %v5037_v31 }
 0x6b7   : > { %v3988_v47 = vsel %vm3979_vm7, %v3971_v36, %v5038_v2  ;;  %v3989_v52 = vsel %vm3979_vm7, %v3972_v28, %v5039_v42  ;;  %v3978_v28 = vsel %vm2641_vm6, %v3962_v1, %v5079_v56  ;;  %v3977_v36 = vsel %vm2641_vm6, %v3961_v14, %v5078_v22 }
 0x6b8   : > { %v4016_v5 = vpack.c.bf16 %v3989_v52, %v3988_v47 }
 0x6ba   : > { %4099 = vmatmul.bf16.gmra.mxu0 %v4016_v5 }
 0x6da   : > { %v5052_v34 = vpop.permute.xlu2 %5051 }
 0x6db   : > { %v5054_v39 = vunpack.i.h.bf16 %v5052_v34  ;;  %v5053_v24 = vunpack.i.l.bf16 %v5052_v34 }
 0x6dd   : > { %v3990_v15 = vsel %vm3979_vm7, %v3973_v3, %v5053_v24  ;;  %v3991_v45 = vsel %vm3979_vm7, %v3974_v43, %v5054_v39 }
 0x6de   : > { %v4017_v30 = vpack.c.bf16 %v3991_v45, %v3990_v15 }
 0x6e0   : > { %4104 = vmatmul.bf16.gmra.mxu0 %v4017_v30 }
 0x6e2   : > { %v5067_v9 = vpop.permute.xlu2 %5066 }
 0x6e3   : > { %v5069_v16 = vunpack.i.h.bf16 %v5067_v9  ;;  %v5068_v53 = vunpack.i.l.bf16 %v5067_v9 }
 0x6e5   : > { %v3992_v33 = vsel %vm3979_vm7, %v3975_v37, %v5068_v53  ;;  %v3993_v12 = vsel %vm3979_vm7, %v3976_v11, %v5069_v16 }
 0x6e6   : > { %v4018_v40 = vpack.c.bf16 %v3993_v12, %v3992_v33 }
 0x6f0   : > { %4109 = vmatmul.bf16.gmra.mxu0 %v4018_v40  ;;  %v4148_v40 = vld [vmem:[%s6688_s6 + $0x10] sm:$0x1] }
 0x6f2   : > { %v4080_v23 = vpop.f32.mrf.mxu0 }
 0x6f3   : > { %v4081_v58 = vadd.f32 %v4080_v23, %v6587_v61  ;;  %v4149_v23 = vunpack.c.l.bf16 %v4148_v40 }
 0x6f5   : > { %v4120_v32 = vmax.f32 %v4081_v58, 0.0  ;;  %v4150_v50 = vperm.slane %v4149_v23, 0 }
 0x6fa   : > { %v4082_v29 = vpop.f32.mrf.mxu0 }
 0x6fb   : > { %v4083_v18 = vadd.f32 %v4082_v29, %v6587_v61 }
 0x6fd   : > { %v4121_v59 = vmax.f32 %v4083_v18, 0.0 }
 0x6ff   : > { %v4140_v6 = vpack.c.bf16 %v4121_v59, %v4120_v32 }
 0x700   : > { %v5082_v31 = vpop.permute.xlu2 %5081 }
 0x701   : > { %v5084_v42 = vunpack.i.h.bf16 %v5082_v31  ;;  %v5083_v2 = vunpack.i.l.bf16 %v5082_v31  ;;  %4640 = vmatmul.msk.bf16.vlgmr.msra.gmra.mxu1 %vm2377_vm4, %v4140_v6 }
 0x703   : > { %v3994_v47 = vsel %vm3979_vm7, %v3977_v36, %v5083_v2  ;;  %v3995_v52 = vsel %vm3979_vm7, %v3978_v28, %v5084_v42 }
 0x704   : > { %v4019_v5 = vpack.c.bf16 %v3995_v52, %v3994_v47 }
 0x706   : > { %4114 = vmatmul.bf16.gmra.mxu0 %v4019_v5  ;;  %v4085_v62 = vpop.f32.mrf.mxu0 }
 0x707   : > { %v4086_v41 = vadd.f32 %v4085_v62, %v6587_v61 }
 0x709   : > { %v4122_v0 = vmax.f32 %v4086_v41, 0.0 }
 0x70e   : > { %v4087_v26 = vpop.f32.mrf.mxu0 }
 0x70f   : > { %v4088_v60 = vadd.f32 %v4087_v26, %v6587_v61 }
 0x711   : > { %v4123_v51 = vmax.f32 %v4088_v60, 0.0 }
 0x713   : > { %v4141_v25 = vpack.c.bf16 %v4123_v51, %v4122_v0 }
 0x715   : > { %4641 = vmatmul.msk.bf16.gmra.mxu1 %vm2377_vm4, %v4141_v25 }
 0x716   : > { %v4090_v8 = vpop.f32.mrf.mxu0 }
 0x717   : > { %v4091_v21 = vadd.f32 %v4090_v8, %v6587_v61 }
 0x719   : > { %v4124_v34 = vmax.f32 %v4091_v21, 0.0 }
 0x71e   : > { %v4092_v17 = vpop.f32.mrf.mxu0 }
 0x71f   : > { %v4093_v35 = vadd.f32 %v4092_v17, %v6587_v61 }
 0x721   : > { %v4125_v46 = vmax.f32 %v4093_v35, 0.0 }
 0x723   : > { %v4142_v20 = vpack.c.bf16 %v4125_v46, %v4124_v34 }
 0x725   : > { %4642 = vmatmul.msk.bf16.gmra.mxu1 %vm2377_vm4, %v4142_v20 }
 0x727   : > { %v4095_v39 = vpop.f32.mrf.mxu0 }
 0x728   : > { %v4096_v24 = vadd.f32 %v4095_v39, %v6587_v61 }
 0x72a   : > { %v4126_v15 = vmax.f32 %v4096_v24, 0.0 }
 0x72f   : > { %v4097_v43 = vpop.f32.mrf.mxu0 }
 0x730   : > { %v4098_v3 = vadd.f32 %v4097_v43, %v6587_v61 }
 0x732   : > { %v4127_v45 = vmax.f32 %v4098_v3, 0.0 }
 0x734   : > { %v4143_v38 = vpack.c.bf16 %v4127_v45, %v4126_v15 }
 0x736   : > { %4643 = vmatmul.msk.bf16.gmra.mxu1 %vm2377_vm4, %v4143_v38 }
 0x737   : > { %v4100_v30 = vpop.f32.mrf.mxu0 }
 0x738   : > { %v4101_v55 = vadd.f32 %v4100_v30, %v6587_v61 }
 0x73a   : > { %v4128_v44 = vmax.f32 %v4101_v55, 0.0 }
 0x73f   : > { %v4102_v49 = vpop.f32.mrf.mxu0 }
 0x740   : > { %v4103_v9 = vadd.f32 %v4102_v49, %v6587_v61 }
 0x742   : > { %v4129_v4 = vmax.f32 %v4103_v9, 0.0 }
 0x744   : > { %v4144_v7 = vpack.c.bf16 %v4129_v4, %v4128_v44 }
 0x746   : > { %4644 = vmatmul.msk.bf16.gmra.mxu1 %vm2377_vm4, %v4144_v7 }
 0x75d   : > { %v4105_v10 = vpop.f32.mrf.mxu0 }
 0x75e   : > { %v4106_v16 = vadd.f32 %v4105_v10, %v6587_v61 }
 0x760   : > { %v4130_v54 = vmax.f32 %v4106_v16, 0.0 }
 0x765   : > { %v4107_v53 = vpop.f32.mrf.mxu0 }
 0x766   : > { %v4108_v57 = vadd.f32 %v4107_v53, %v6587_v61 }
 0x768   : > { %v4131_v11 = vmax.f32 %v4108_v57, 0.0 }
 0x76a   : > { %v4145_v37 = vpack.c.bf16 %v4131_v11, %v4130_v54 }
 0x76c   : > { %4645 = vmatmul.msk.bf16.vlgmr.msrb.gmra.mxu3 %vm2377_vm4, %v4145_v37 }
 0x76d   : > { %v4110_v33 = vpop.f32.mrf.mxu0 }
 0x76e   : > { %v4111_v12 = vadd.f32 %v4110_v33, %v6587_v61 }
 0x770   : > { %v4132_v58 = vmax.f32 %v4111_v12, 0.0 }
 0x775   : > { %v4112_v27 = vpop.f32.mrf.mxu0 }
 0x776   : > { %v4113_v48 = vadd.f32 %v4112_v27, %v6587_v61 }
 0x778   : > { %v4133_v13 = vmax.f32 %v4113_v48, 0.0 }
 0x77a   : > { %v4146_v29 = vpack.c.bf16 %v4133_v13, %v4132_v58 }
 0x77c   : > { %4646 = vmatmul.msk.bf16.gmra.mxu3 %vm2377_vm4, %v4146_v29 }
 0x77e   : > { %v4196_v18 = vpop.f32.mrf.mxu1 }
 0x77f   : > { %v4197_v19 = vadd.f32 %v4196_v18, %v4150_v50 }
 0x781   : > { %4236 = vst [vmem:[%s6626_s15] sm:$0xff] %v4197_v19 }
 0x783   : > { %v4115_v63 = vpop.f32.mrf.mxu0 }
 0x784   : > { %v4116_v56 = vadd.f32 %v4115_v63, %v6587_v61 }
 0x786   : > { %v4198_v32 = vpop.f32.mrf.mxu1  ;;  %v4134_v31 = vmax.f32 %v4116_v56, 0.0 }
 0x787   : > { %v4199_v59 = vadd.f32 %v4198_v32, %v4150_v50 }
 0x789   : > { %4237 = vst [vmem:[%s6626_s15 + $0x8] sm:$0xff] %v4199_v59 }
 0x78b   : > { %v4117_v22 = vpop.f32.mrf.mxu0 }
 0x78c   : > { %v4118_v6 = vadd.f32 %v4117_v22, %v6587_v61 }
 0x78e   : > { %v4135_v1 = vmax.f32 %v4118_v6, 0.0 }
 0x790   : > { %v4147_v14 = vpack.c.bf16 %v4135_v1, %v4134_v31 }
 0x792   : > { %4647 = vmatmul.msk.bf16.gmra.mxu3 %vm2377_vm4, %v4147_v14  ;;  %v4201_v42 = vpop.f32.mrf.mxu1 }
 0x793   : > { %v4202_v2 = vadd.f32 %v4201_v42, %v4150_v50 }
 0x795   : > { %4238 = vst [vmem:[%s6626_s15 + $0x10] sm:$0xff] %v4202_v2 }
 0x79a   : > { %v4203_v28 = vpop.f32.mrf.mxu1 }
 0x79b   : > { %v4204_v36 = vadd.f32 %v4203_v28, %v4150_v50 }
 0x79d   : > { %4239 = vst [vmem:[%s6626_s15 + $0x18] sm:$0xff] %v4204_v36 }
 0x7a2   : > { %v4206_v47 = vpop.f32.mrf.mxu1 }
 0x7a3   : > { %v4207_v52 = vadd.f32 %v4206_v47, %v4150_v50 }
 0x7a5   : > { %4240 = vst [vmem:[%s6626_s15 + $0x20] sm:$0xff] %v4207_v52 }
 0x7aa   : > { %v4208_v61 = vpop.f32.mrf.mxu1 }
 0x7ab   : > { %v4209_v5 = vadd.f32 %v4208_v61, %v4150_v50 }
 0x7ad   : > { %4241 = vst [vmem:[%s6626_s15 + $0x28] sm:$0xff] %v4209_v5 }
 0x7b3   : > { %v4211_v62 = vpop.f32.mrf.mxu1 }
 0x7b4   : > { %v4212_v41 = vadd.f32 %v4211_v62, %v4150_v50 }
 0x7b6   : > { %4242 = vst [vmem:[%s6626_s15 + $0x30] sm:$0xff] %v4212_v41 }
 0x7bb   : > { %v4213_v26 = vpop.f32.mrf.mxu1 }
 0x7bc   : > { %v4214_v60 = vadd.f32 %v4213_v26, %v4150_v50 }
 0x7be   : > { %4243 = vst [vmem:[%s6626_s15 + $0x38] sm:$0xff] %v4214_v60 }
 0x7c3   : > { %v4216_v0 = vpop.f32.mrf.mxu1 }
 0x7c4   : > { %v4217_v51 = vadd.f32 %v4216_v0, %v4150_v50 }
 0x7c6   : > { %4244 = vst [vmem:[%s6626_s15 + $0x40] sm:$0xff] %v4217_v51 }
 0x7cb   : > { %v4218_v25 = vpop.f32.mrf.mxu1 }
 0x7cc   : > { %v4219_v8 = vadd.f32 %v4218_v25, %v4150_v50 }
 0x7ce   : > { %4245 = vst [vmem:[%s6626_s15 + $0x48] sm:$0xff] %v4219_v8 }
 0x7ef   : > { %v4221_v21 = vpop.f32.mrf.mxu3 }
 0x7f0   : > { %v4222_v17 = vadd.f32 %v4221_v21, %v4150_v50 }
 0x7f2   : > { %4246 = vst [vmem:[%s6626_s15 + $0x50] sm:$0xff] %v4222_v17 }
 0x7f7   : > { %v4223_v35 = vpop.f32.mrf.mxu3 }
 0x7f8   : > { %v4224_v34 = vadd.f32 %v4223_v35, %v4150_v50 }
 0x7fa   : > { %4247 = vst [vmem:[%s6626_s15 + $0x58] sm:$0xff] %v4224_v34 }
 0x7ff   : > { %v4226_v46 = vpop.f32.mrf.mxu3 }
 0x800   : > { %v4227_v20 = vadd.f32 %v4226_v46, %v4150_v50 }
 0x802   : > { %4248 = vst [vmem:[%s6626_s15 + $0x60] sm:$0xff] %v4227_v20 }
 0x807   : > { %v4228_v39 = vpop.f32.mrf.mxu3 }
 0x808   : > { %v4229_v24 = vadd.f32 %v4228_v39, %v4150_v50 }
 0x80a   : > { %4249 = vst [vmem:[%s6626_s15 + $0x68] sm:$0xff] %v4229_v24 }
 0x815   : > { %v4231_v43 = vpop.f32.mrf.mxu3 }
 0x816   : > { %v4232_v3 = vadd.f32 %v4231_v43, %v4150_v50 }
 0x818   : > { %4250 = vst [vmem:[%s6626_s15 + $0x70] sm:$0xff] %v4232_v3 }
 0x81d   : > { %v4233_v15 = vpop.f32.mrf.mxu3 }
 0x81e   : > { %v4234_v45 = vadd.f32 %v4233_v15, %v4150_v50 }
 0x820   : > { %4251 = vst [vmem:[%s6626_s15 + $0x78] sm:$0xff] %v4234_v45 }
 0x821   : > { %5112 = shalt.err (!%p5109_p3)
}
 0x822   : > { %s5154_s13 = smov 128  }
 0x823   : > { %4680 = dma.vmem_to_hbm [thread:$0]  (%p5233_p5), %s4266_s20, 2048, %s4268_s19, %s4253_s22, %s5154_s13, %s5154_s13, %s5149_s21  }
 0x824 PF: > { %p4686_p4 = scmp.ge.s32.totalorder %s5147_s27, 2  ;;  %s4282_s15 = sand.u32 1, %s5135_s24  }
 0x825   : > { %s4283_s14 = scalar_lea.sflag [#allocation3], %s4282_s15 }
 0x826   : > { %p4683_p7 = pnand %p4686_p4, %p5237_p6 }
 0x828   : > { %p4684_p8 = pneg %p4683_p7 }
 0x82a   : > { %5130 = dma.done.wait (%p4684_p8), %s4283_s14, 2048  }
 0x82b   : > { %5132 = vsyncadd (%p4684_p8), %s4283_s14, 4294965248  ;;  %p17_p9 = scmp.ge.s32.totalorder %s5220_s30, 4   ;;  %s6722_s24 = smov %s5139_s25 }
 0x82c   : > { %s6723_s25 = smov %s5143_s26  ;;  %s6724_s26 = smov %s5231_s10 }
 0x82d   : > { %s6725_s27 = smov %s5220_s30  ;;  %19 = sbr.rel (!%p17_p9) target bundleno = 3 (0x3), region = 95 }
 0x832   :  { %4289 = vsyncpa [#allocation3], 1 }
 0x833   :  { %4291 = vsyncpa [#allocation3 + $0x1], 1 }

</bundles_post_ra>
